<compile_context>
chip_gen: v7x
topology: tpu7x:2x2x1
jax: 0.10.0
libtpu: 0.0.40
codegen_flags: <defaults>
</compile_context>

<pallas_src>
import functools
import math

import numpy as np
import jax
import jax.numpy as jnp
from jax import lax
from jax.experimental import pallas as pl
from jax.experimental.pallas import tpu as pltpu

_BN_EPS = 1e-5
_LANE = 128


def _round_up(x, m):
    return ((x + m - 1) // m) * m


def _pick_tile_h(H, Wp, target_rows=256):
    """Largest divisor Th of H with Th*Wp <= target flattened rows (falls back to 1)."""
    best = 1
    for th in range(1, H + 1):
        if H % th == 0 and th * Wp <= target_rows:
            best = th
    return best


def _block_kernel(x_ref, w1_ref, wdw_ref, w2_ref, o_ref, *,
                  ksize, pad, Wp, Th, cin_half):
    """One (image, row-band) step of the fused stride-1 ShuffleNet-v2 block.

    x_ref  : (1, Hp*Wp, C)     padded, channel-permuted [proj | main] image (resident per n), f32
    w1_ref : (C, cmid_p)       bf16, BN folded, proj rows zeroed (folds the odd-channel select)
    wdw_ref: (K*K, cmid_p)     f32,  BN folded depthwise taps
    w2_ref : (cmid_p, Cout)    bf16, BN folded, proj columns zeroed (places main into its lanes)
    o_ref  : (1, Th*Wp, Cout)  f32, final concatenated NHWC band (padded columns hold junk,
                               cropped by the wrapper)
    """
    j = pl.program_id(1)
    cmid_p = w1_ref.shape[1]
    out_rows = Th * Wp                      # interior rows written this step
    band_rows = (Th + 2 * pad) * Wp         # interior rows + row halo read this step
    S = pad * Wp                            # halo offset (Wp % 8 == 0 -> aligned)

    base = pl.multiple_of(j * out_rows, 8)
    xb = x_ref[0, pl.ds(base, band_rows), :]          # (band_rows, C) f32, includes row halo

    # --- 1x1 pw conv (+BN fold, +odd-channel selection folded into zero rows) -> ReLU. bf16 MXU, f32 acc.
    y = jnp.maximum(
        jnp.dot(xb.astype(jnp.bfloat16), w1_ref[...],
                preferred_element_type=jnp.float32), 0.0)          # (band_rows, cmid_p) f32

    # --- k x k depthwise conv (+BN fold), stride 1.  Column (dj) shifts are one-time
    # whole-band sublane rolls on the XLU; row (di) shifts are Wp-aligned slices.
    # Roll wrap-around only pollutes padded-column positions, which the wrapper crops.
    # TODO(synk): on v6e/v7x the dw multiplies could run in bf16 (keep f32 on v5e).
    shifted = [y if d == 0 else pltpu.roll(y, (-d) % band_rows, axis=0)
               for d in range(-pad, pad + 1)]          # shifted[dj][r] == y[r + dj - pad]
    wdw = wdw_ref[...]                                  # (K*K, cmid_p), loaded once per band
    acc0 = jnp.zeros((out_rows, cmid_p), jnp.float32)
    acc1 = jnp.zeros((out_rows, cmid_p), jnp.float32)
    for di in range(ksize):
        for dj in range(ksize):
            t = di * ksize + dj
            contrib = shifted[dj][di * Wp: di * Wp + out_rows, :] * wdw[t: t + 1, :]
            if t % 2 == 0:                              # two accumulators -> VALU ILP
                acc0 = acc0 + contrib
            else:
                acc1 = acc1 + contrib
    acc = acc0 + acc1

    # --- 1x1 pw conv (+BN fold) -> ReLU.  bf16 MXU, 128-deep contraction, f32 acc.
    # w2 is widened to Cout lanes with zero proj columns, so the MXU places the main
    # branch directly into its output lanes (fused concat, no lane shuffles).
    main = jnp.maximum(
        jnp.dot(acc.astype(jnp.bfloat16), w2_ref[...],
                preferred_element_type=jnp.float32), 0.0)          # (out_rows, Cout) f32

    # Fused channel_shuffle concat: proj lanes pass the input through exactly (f32),
    # main lanes take the branch result.  One full-block store.
    x_int = xb[S: S + out_rows, :]                      # aligned interior rows of the band
    lane = lax.broadcasted_iota(jnp.int32, main.shape, 1)
    o_ref[0] = jnp.where(lane < cin_half, x_int, main).astype(o_ref.dtype)


def init_params(key, input_channel, output_channel, channel_scales, ksize):
    """One raw (w1, wdw, w2) triple per channel scale, deterministic init."""
    assert input_channel == output_channel, "stride=1 regular block requires in==out"
    cin_half = input_channel // 2
    cout_main = output_channel - cin_half
    params = []
    for i, s in enumerate(channel_scales):
        mid = int(output_channel // 2 * s)
        k1, k2, k3 = jax.random.split(jax.random.fold_in(key, i), 3)
        w1 = 0.1 * jax.random.normal(k1, (cin_half, mid), jnp.float32)        # pw1 (Cin_half, Cmid)
        wdw = 0.1 * jax.random.normal(k2, (ksize * ksize, mid), jnp.float32)  # dw taps (K*K, Cmid)
        w2 = 0.1 * jax.random.normal(k3, (mid, cout_main), jnp.float32)       # pw2 (Cmid, Cout_main)
        params.append((w1, wdw, w2))
    return params


def prepare_kernel_params(params, input_channel, ksize):
    """One-time constant fold + layout prep for the kernel:
    * fold the affine-free BatchNorm scale 1/sqrt(var+eps) (fresh running stats) into each
      conv weight (ReLU commutes with a positive per-channel scale);
    * fold channel_shuffle's odd-channel selection into w1 (zero rows for proj channels)
      and the output concat placement into a widened w2 (zero columns for proj lanes);
    * zero-pad the mid channel dim to the 128-lane width (lane-dense dw + 128-deep pw2);
    * store the matmul weights in bf16 (MXU-native), depthwise taps stay f32."""
    bn = 1.0 / math.sqrt(1.0 + _BN_EPS)
    C = input_channel
    cin_half = C // 2
    prepared = []
    for (w1, wdw, w2) in params:
        mid = w1.shape[1]
        cout_main = w2.shape[1]
        assert cin_half + cout_main == C, "stride=1 regular block: Cout == Cin"
        cmid_p = _round_up(mid, _LANE)
        w1_full = (jnp.zeros((C, cmid_p), jnp.float32)
                   .at[cin_half:, :mid].set(w1 * bn).astype(jnp.bfloat16))
        wdw_p = jnp.zeros((ksize * ksize, cmid_p), jnp.float32).at[:, :mid].set(wdw * bn)
        w2_wide = (jnp.zeros((cmid_p, C), jnp.float32)
                   .at[:mid, cin_half:].set(w2 * bn).astype(jnp.bfloat16))
        prepared.append((w1_full, wdw_p, w2_wide))
    return prepared


def shufflenet_cs_block_forward(x_nchw, prepared_params, channel_choice, ksize=3, stride=1):
    # TODO(synk): stride=2 down-sample path, 'xception' mode and SE not implemented.
    assert stride == 1, "only the stride=1 regular block is implemented"
    N, C, H, W = x_nchw.shape
    assert C % 2 == 0
    pad = ksize // 2
    cin_half = C // 2

    w1_full, wdw_p, w2_wide = prepared_params[channel_choice]
    assert w1_full.shape[0] == C and w2_wide.shape[1] == C
    cmid_p = w1_full.shape[1]

    # Spatial padding: W padded so Wp % 8 == 0 (aligned dw tap shifts); extra right
    # columns are zero and cropped.  Zero spatial padding is equivalent to the dw conv's
    # padding because pw1 is bias-free and BN is affine=False with zero running mean.
    Wp = _round_up(W + 2 * pad, 8)
    Hp = H + 2 * pad
    Th = _pick_tile_h(H, Wp)

    # channel_shuffle fold: permute channels so lanes [0:cin_half) are the proj (even)
    # channels and [cin_half:C) the main (odd) channels; selection/concat happen in-kernel.
    perm = np.concatenate([np.arange(0, C, 2), np.arange(1, C, 2)])
    # TODO(synk): the NCHW<->NHWC transposes are imposed by the module's NCHW interface;
    #             a multi-block pipeline should keep activations channels-last instead.
    x_nhwc = jnp.transpose(x_nchw[:, perm], (0, 2, 3, 1))
    xp = jnp.pad(x_nhwc, ((0, 0), (pad, pad), (pad, Wp - W - pad), (0, 0)))
    x3d = xp.reshape(N, Hp * Wp, C)

    kernel = functools.partial(_block_kernel, ksize=ksize, pad=pad, Wp=Wp, Th=Th,
                               cin_half=cin_half)
    out3d = pl.pallas_call(
        kernel,
        out_shape=jax.ShapeDtypeStruct((N, H * Wp, C), x_nchw.dtype),
        grid=(N, H // Th),
        in_specs=[
            # whole padded image; index ignores the band axis -> stays resident per image
            pl.BlockSpec((1, Hp * Wp, C), lambda n, j: (n, 0, 0)),
            # weights: same block every step -> resident in VMEM
            pl.BlockSpec((C, cmid_p), lambda n, j: (0, 0)),
            pl.BlockSpec((ksize * ksize, cmid_p), lambda n, j: (0, 0)),
            pl.BlockSpec((cmid_p, C), lambda n, j: (0, 0)),
        ],
        out_specs=pl.BlockSpec((1, Th * Wp, C), lambda n, j: (n, j, 0)),
        compiler_params=pltpu.CompilerParams(
            # batch and row-band axes are both independent -> finer megacore sharding
            dimension_semantics=("parallel", "parallel"),
            # per-step working set (resident image + band temps) is << 32 MiB even at
            # real ShuffleNet sizes; also fits v7x's smaller physical VMEM.
            vmem_limit_bytes=32 * 1024 * 1024,
        ),
    )(x3d, w1_full, wdw_p, w2_wide)

    # Column crop + layout restore fuse into the (mandatory) NHWC->NCHW transpose.
    out = out3d.reshape(N, H, Wp, C)[:, :, pad:pad + W, :]
    return jnp.transpose(out, (0, 3, 1, 2))


def reference_forward(x_nchw, params, channel_choice, ksize=3):
    """Pure-JAX (lax.conv, f32) reference of the module's forward pass (raw params)."""
    pad = ksize // 2
    w1, wdw, w2 = params[channel_choice]
    cin_half, cmid = w1.shape
    cout_main = w2.shape[1]
    bn = 1.0 / jnp.sqrt(1.0 + _BN_EPS)

    x_proj = x_nchw[:, 0::2]
    x_main = x_nchw[:, 1::2]

    w1_oihw = w1.T.reshape(cmid, cin_half, 1, 1)
    y = lax.conv_general_dilated(x_main, w1_oihw, (1, 1), 'VALID')
    y = jnp.maximum(y * bn, 0.0)

    wdw_oihw = wdw.T.reshape(cmid, 1, ksize, ksize)
    y = lax.conv_general_dilated(y, wdw_oihw, (1, 1), [(pad, pad), (pad, pad)],
                                 feature_group_count=cmid)
    y = y * bn

    w2_oihw = w2.T.reshape(cout_main, cmid, 1, 1)
    y = lax.conv_general_dilated(y, w2_oihw, (1, 1), 'VALID')
    y = jnp.maximum(y * bn, 0.0)
    return jnp.concatenate([x_proj, y], axis=1)


if __name__ == "__main__":
    key = jax.random.PRNGKey(0)
    kx, kp = jax.random.split(key)

    # Small shapes consistent with the module: NCHW input.
    N, C, H, W = 2, 16, 16, 16
    input_channel = output_channel = C
    ksize, stride = 3, 1
    channel_scales = (0.5, 1.0, 1.5, 2.0)
    channel_choice = 2   # mid_channel = 16 // 2 * 1.5 = 12

    x = jax.random.normal(kx, (N, C, H, W), jnp.float32)
    params = init_params(kp, input_channel, output_channel, channel_scales, ksize)
    kparams = prepare_kernel_params(params, input_channel, ksize)   # BN fold + bf16 + lane prep

    out = shufflenet_cs_block_forward(x, kparams, channel_choice, ksize=ksize, stride=stride)
    out = jax.block_until_ready(out)

    ref = jax.block_until_ready(reference_forward(x, params, channel_choice, ksize=ksize))
    assert out.shape == (N, output_channel, H, W), out.shape
    # Tolerance covers the bf16 MXU inputs on the main branch; the proj half is exact f32.
    np.testing.assert_allclose(np.asarray(out), np.asarray(ref), rtol=2e-2, atol=3e-3)

    print("KERNEL_OK")
</pallas_src>

<mosaic_0001>
module attributes {stable_mosaic.version = 11 : i64} {
  func.func @_block_kernel(%arg0: i32, %arg1: i32, %arg2: memref<1x432x16xf32, #tpu.memory_space<vmem>>, %arg3: memref<16x128xbf16, #tpu.memory_space<vmem>>, %arg4: memref<9x128xf32, #tpu.memory_space<vmem>>, %arg5: memref<128x16xbf16, #tpu.memory_space<vmem>>, %arg6: memref<1x192x16xf32, #tpu.memory_space<vmem>>) attributes {dimension_semantics = [#tpu.dimension_semantics<parallel>, #tpu.dimension_semantics<parallel>], iteration_bounds = array<i64: 2, 2>, scalar_prefetch = 0 : i64, scratch_operands = 0 : i64, tpu.core_type = #tpu.core_type<tc>, window_params = [{transform_indices = @transform_0, window_bounds = array<i64: 1, 432, 16>}, {pipeline_mode = #tpu.pipeline_mode<synchronous>, transform_indices = @transform_1, window_bounds = array<i64: 16, 128>}, {pipeline_mode = #tpu.pipeline_mode<synchronous>, transform_indices = @transform_2, window_bounds = array<i64: 9, 128>}, {pipeline_mode = #tpu.pipeline_mode<synchronous>, transform_indices = @transform_3, window_bounds = array<i64: 128, 16>}, {transform_indices = @transform_4, window_bounds = array<i64: 1, 192, 16>}]} {
    %c192_i32 = arith.constant 192 : i32
    %0 = arith.muli %arg1, %c192_i32 : i32
    %1 = tpu.assume_multiple %0, 8 : i32
    %c0 = arith.constant 0 : index
    %2 = arith.index_cast %1 : i32 to index
    %c0_0 = arith.constant 0 : index
    %3 = vector.load %arg2[%c0, %2, %c0_0] : memref<1x432x16xf32, #tpu.memory_space<vmem>>, vector<1x240x16xf32>
    %4 = vector.shape_cast %3 : vector<1x240x16xf32> to vector<240x16xf32>
    %5 = arith.truncf %4 : vector<240x16xf32> to vector<240x16xbf16>
    %c0_1 = arith.constant 0 : index
    %c0_2 = arith.constant 0 : index
    %6 = vector.load %arg3[%c0_1, %c0_2] : memref<16x128xbf16, #tpu.memory_space<vmem>>, vector<16x128xbf16>
    %cst = arith.constant dense<0.000000e+00> : vector<240x128xf32>
    %7 = tpu.matmul %5, %6, %cst {dimension_numbers = #tpu.dot_dimension_numbers<[1], [0], [0], [1], [0, 0, 1, 1], [], []>} : vector<240x16xbf16>, vector<16x128xbf16>, vector<240x128xf32> -> vector<240x128xf32>
    %cst_3 = arith.constant 0.000000e+00 : f32
    %8 = vector.broadcast %cst_3 : f32 to vector<240x128xf32>
    %9 = arith.maximumf %7, %8 : vector<240x128xf32>
    %c1_i32 = arith.constant 1 : i32
    %10 = tpu.dynamic_rotate %9 by %c1_i32 dim 0 : vector<240x128xf32>, i32 -> vector<240x128xf32>
    %c239_i32 = arith.constant 239 : i32
    %11 = tpu.dynamic_rotate %9 by %c239_i32 dim 0 : vector<240x128xf32>, i32 -> vector<240x128xf32>
    %c0_4 = arith.constant 0 : index
    %c0_5 = arith.constant 0 : index
    %12 = vector.load %arg4[%c0_4, %c0_5] : memref<9x128xf32, #tpu.memory_space<vmem>>, vector<9x128xf32>
    %cst_6 = arith.constant 0.000000e+00 : f32
    %13 = vector.broadcast %cst_6 : f32 to vector<192x128xf32>
    %cst_7 = arith.constant 0.000000e+00 : f32
    %14 = vector.broadcast %cst_7 : f32 to vector<192x128xf32>
    %15 = vector.extract_strided_slice %10 {offsets = [0, 0], sizes = [192, 128], strides = [1, 1]} : vector<240x128xf32> to vector<192x128xf32>
    %16 = vector.extract_strided_slice %12 {offsets = [0, 0], sizes = [1, 128], strides = [1, 1]} : vector<9x128xf32> to vector<1x128xf32>
    %17 = vector.broadcast %16 : vector<1x128xf32> to vector<192x128xf32>
    %18 = arith.mulf %15, %17 : vector<192x128xf32>
    %19 = arith.addf %13, %18 : vector<192x128xf32>
    %20 = vector.extract_strided_slice %9 {offsets = [0, 0], sizes = [192, 128], strides = [1, 1]} : vector<240x128xf32> to vector<192x128xf32>
    %21 = vector.extract_strided_slice %12 {offsets = [1, 0], sizes = [1, 128], strides = [1, 1]} : vector<9x128xf32> to vector<1x128xf32>
    %22 = vector.broadcast %21 : vector<1x128xf32> to vector<192x128xf32>
    %23 = arith.mulf %20, %22 : vector<192x128xf32>
    %24 = arith.addf %14, %23 : vector<192x128xf32>
    %25 = vector.extract_strided_slice %11 {offsets = [0, 0], sizes = [192, 128], strides = [1, 1]} : vector<240x128xf32> to vector<192x128xf32>
    %26 = vector.extract_strided_slice %12 {offsets = [2, 0], sizes = [1, 128], strides = [1, 1]} : vector<9x128xf32> to vector<1x128xf32>
    %27 = vector.broadcast %26 : vector<1x128xf32> to vector<192x128xf32>
    %28 = arith.mulf %25, %27 : vector<192x128xf32>
    %29 = arith.addf %19, %28 : vector<192x128xf32>
    %30 = vector.extract_strided_slice %10 {offsets = [24, 0], sizes = [192, 128], strides = [1, 1]} : vector<240x128xf32> to vector<192x128xf32>
    %31 = vector.extract_strided_slice %12 {offsets = [3, 0], sizes = [1, 128], strides = [1, 1]} : vector<9x128xf32> to vector<1x128xf32>
    %32 = vector.broadcast %31 : vector<1x128xf32> to vector<192x128xf32>
    %33 = arith.mulf %30, %32 : vector<192x128xf32>
    %34 = arith.addf %24, %33 : vector<192x128xf32>
    %35 = vector.extract_strided_slice %9 {offsets = [24, 0], sizes = [192, 128], strides = [1, 1]} : vector<240x128xf32> to vector<192x128xf32>
    %36 = vector.extract_strided_slice %12 {offsets = [4, 0], sizes = [1, 128], strides = [1, 1]} : vector<9x128xf32> to vector<1x128xf32>
    %37 = vector.broadcast %36 : vector<1x128xf32> to vector<192x128xf32>
    %38 = arith.mulf %35, %37 : vector<192x128xf32>
    %39 = arith.addf %29, %38 : vector<192x128xf32>
    %40 = vector.extract_strided_slice %11 {offsets = [24, 0], sizes = [192, 128], strides = [1, 1]} : vector<240x128xf32> to vector<192x128xf32>
    %41 = vector.extract_strided_slice %12 {offsets = [5, 0], sizes = [1, 128], strides = [1, 1]} : vector<9x128xf32> to vector<1x128xf32>
    %42 = vector.broadcast %41 : vector<1x128xf32> to vector<192x128xf32>
    %43 = arith.mulf %40, %42 : vector<192x128xf32>
    %44 = arith.addf %34, %43 : vector<192x128xf32>
    %45 = vector.extract_strided_slice %10 {offsets = [48, 0], sizes = [192, 128], strides = [1, 1]} : vector<240x128xf32> to vector<192x128xf32>
    %46 = vector.extract_strided_slice %12 {offsets = [6, 0], sizes = [1, 128], strides = [1, 1]} : vector<9x128xf32> to vector<1x128xf32>
    %47 = vector.broadcast %46 : vector<1x128xf32> to vector<192x128xf32>
    %48 = arith.mulf %45, %47 : vector<192x128xf32>
    %49 = arith.addf %39, %48 : vector<192x128xf32>
    %50 = vector.extract_strided_slice %9 {offsets = [48, 0], sizes = [192, 128], strides = [1, 1]} : vector<240x128xf32> to vector<192x128xf32>
    %51 = vector.extract_strided_slice %12 {offsets = [7, 0], sizes = [1, 128], strides = [1, 1]} : vector<9x128xf32> to vector<1x128xf32>
    %52 = vector.broadcast %51 : vector<1x128xf32> to vector<192x128xf32>
    %53 = arith.mulf %50, %52 : vector<192x128xf32>
    %54 = arith.addf %44, %53 : vector<192x128xf32>
    %55 = vector.extract_strided_slice %11 {offsets = [48, 0], sizes = [192, 128], strides = [1, 1]} : vector<240x128xf32> to vector<192x128xf32>
    %56 = vector.extract_strided_slice %12 {offsets = [8, 0], sizes = [1, 128], strides = [1, 1]} : vector<9x128xf32> to vector<1x128xf32>
    %57 = vector.broadcast %56 : vector<1x128xf32> to vector<192x128xf32>
    %58 = arith.mulf %55, %57 : vector<192x128xf32>
    %59 = arith.addf %49, %58 : vector<192x128xf32>
    %60 = arith.addf %59, %54 : vector<192x128xf32>
    %61 = arith.truncf %60 : vector<192x128xf32> to vector<192x128xbf16>
    %c0_8 = arith.constant 0 : index
    %c0_9 = arith.constant 0 : index
    %62 = vector.load %arg5[%c0_8, %c0_9] : memref<128x16xbf16, #tpu.memory_space<vmem>>, vector<128x16xbf16>
    %cst_10 = arith.constant dense<0.000000e+00> : vector<192x16xf32>
    %63 = tpu.matmul %61, %62, %cst_10 {dimension_numbers = #tpu.dot_dimension_numbers<[1], [0], [0], [1], [0, 0, 1, 1], [], []>} : vector<192x128xbf16>, vector<128x16xbf16>, vector<192x16xf32> -> vector<192x16xf32>
    %cst_11 = arith.constant 0.000000e+00 : f32
    %64 = vector.broadcast %cst_11 : f32 to vector<192x16xf32>
    %65 = arith.maximumf %63, %64 : vector<192x16xf32>
    %66 = vector.extract_strided_slice %4 {offsets = [24, 0], sizes = [192, 16], strides = [1, 1]} : vector<240x16xf32> to vector<192x16xf32>
    %67 = tpu.iota {dimensions = array<i32: 1>} : vector<192x16xi32>
    %c8_i32 = arith.constant 8 : i32
    %68 = vector.broadcast %c8_i32 : i32 to vector<192x16xi32>
    %69 = arith.cmpi slt, %67, %68 : vector<192x16xi32>
    %70 = arith.select %69, %66, %65 : vector<192x16xi1>, vector<192x16xf32>
    %c0_12 = arith.constant 0 : index
    %c0_13 = arith.constant 0 : index
    %c0_14 = arith.constant 0 : index
    %71 = vector.load %arg6[%c0_12, %c0_13, %c0_14] : memref<1x192x16xf32, #tpu.memory_space<vmem>>, vector<1x192x16xf32>
    %72 = vector.shape_cast %71 : vector<1x192x16xf32> to vector<192x16xf32>
    %73 = vector.shape_cast %70 : vector<192x16xf32> to vector<1x192x16xf32>
    tpu.vector_store %arg6[%c0_12, %c0_13, %c0_14], %73 {strides = array<i32>} : memref<1x192x16xf32, #tpu.memory_space<vmem>>, vector<1x192x16xf32>,
    return
  }
  func.func @transform_0(%arg0: i32, %arg1: i32) -> (i32, i32, i32) {
    %c0_i32 = arith.constant 0 : i32
    %c0_i32_0 = arith.constant 0 : i32
    %c0_i32_1 = arith.constant 0 : i32
    return %arg0, %c0_i32, %c0_i32_0 : i32, i32, i32
  }
  func.func @transform_1(%arg0: i32, %arg1: i32) -> (i32, i32) {
    %c0_i32 = arith.constant 0 : i32
    %c0_i32_0 = arith.constant 0 : i32
    %c0_i32_1 = arith.constant 0 : i32
    return %c0_i32, %c0_i32_0 : i32, i32
  }
  func.func @transform_2(%arg0: i32, %arg1: i32) -> (i32, i32) {
    %c0_i32 = arith.constant 0 : i32
    %c0_i32_0 = arith.constant 0 : i32
    %c0_i32_1 = arith.constant 0 : i32
    return %c0_i32, %c0_i32_0 : i32, i32
  }
  func.func @transform_3(%arg0: i32, %arg1: i32) -> (i32, i32) {
    %c0_i32 = arith.constant 0 : i32
    %c0_i32_0 = arith.constant 0 : i32
    %c0_i32_1 = arith.constant 0 : i32
    return %c0_i32, %c0_i32_0 : i32, i32
  }
  func.func @transform_4(%arg0: i32, %arg1: i32) -> (i32, i32, i32) {
    %c0_i32 = arith.constant 0 : i32
    %c0_i32_0 = arith.constant 0 : i32
    return %arg0, %arg1, %c0_i32 : i32, i32, i32
  }
}

</mosaic_0001>

<bundles_post_ra>
// kernel: tpu_custom_call.1
= control target key start
LH: loop header
LB: loop body
LE: loop exit
PB: predicated region body
PF: predicated region fallthrough
CT: control target
= control target key end

     0   :  { %s1809_s15 = smov 0   ;;  %s1811_s16 = smov 0   ;;  %s3224_s0 = inlined_call_operand.vmem [shape: f32[2,432,16], index: 0, kind: input, shape index: {}]   ;;  %s3225_s1 = inlined_call_operand.vmem [shape: bf16[16,128], index: 1, kind: input, shape index: {}]   ;;  %s3226_s2 = inlined_call_operand.vmem [shape: f32[9,128], index: 2, kind: input, shape index: {}]   ;;  %s3227_s3 = inlined_call_operand.vmem [shape: bf16[128,16], index: 3, kind: input, shape index: {}]   ;;  %s3228_s4 = inlined_call_operand.vmem [shape: f32[2,384,16], index: 4, kind: output, shape index: {}]  }
   0x1   :  { %s1813_s17 = smov 0   ;;  %s1815_s18 = smov 0  }
   0x2   :  { %s1817_s19 = smov 0  }
   0x3 LB: > { %s23_s20 = sadd.s32 1, %s1772_s17  ;;  %s26_s21 = sadd.s32 1, %s1776_s18  ;;  %s1780_s19 = sphi %s1817_s19, %s14_s19   ;;  %s1776_s18 = sphi %s1815_s18, %s3411_s18   ;;  %s1772_s17 = sphi %s1813_s17, %s3410_s17   ;;  %s1768_s16 = sphi %s1811_s16, %s3409_s16   ;;  %s1764_s15 = sphi %s1809_s15, %s3408_s15  }
   0x4   : > { %p24_p0 = scmp.ge.s32.totalorder %s23_s20, 2  ;;  %p1494_p1 = scmp.ge.s32.totalorder %s1780_s19, 1 }
   0x5   : > { %p176_p2 = scmp.lt.s32.totalorder %s1780_s19, 5 }
   0x6   : > { %s3413_s20 = smov (%p24_p0, %s23_s20), 0  ;;  %s3415_s21 = smov (!%p24_p0, %s26_s21), %s1776_s18 }
   0x7   : > { %p177_p3 = pnand %p1494_p1, %p176_p2  ;;  %p28_p4 = scmp.ge.s32.totalorder %s3415_s21, 2 }
   0x9   : > { %s3417_s21 = smov (%p28_p4, %s3415_s21), 0  ;;  %180 = sbr.rel (%p177_p3) target bundleno = 618 (0x26a), region = 36 }
  0x10   : > { %v1708_v0 = vld [vmem:[%s3225_s1] sm:$0xff]   ;;  %v1782_v1 = vmov 0.0   ;;  %p206_p5 = scmp.lt.s32.totalorder %s1768_s16, 1  ;;  %s222_s24 = smul.u32 192, %s1764_s15  ;;  %vm1783_vm0 = vmmov 0   ;;  %vm277_vm1 = vcmask 130048   ;;  %v3229_v55 = vlaneseq }
  0x11   : > { %1560 = vmatprep.subr.bf16.mxu0 %v1782_v1  ;;  %1662 = vmatprep.subr.bf16.mxu1 %v1782_v1  ;;  %v1709_v47 = vld [vmem:[%s3227_s3] sm:$0xff]   ;;  %v1710_v48 = vld [vmem:[%s3227_s3 + $0x8] sm:$0xff]   ;;  %v1711_v49 = vld [vmem:[%s3227_s3 + $0x10] sm:$0xff]   ;;  %s211_s8 = smul.u32 24, %s1764_s15 }
  0x12   : > { %1561 = vmatpush3.bf16.msra.mxu0 %v1708_v0  ;;  %1663 = vmatpush3.bf16.msra.mxu1 %v1708_v0  ;;  %s3419_s16 = smov (!%p206_p5, %s1768_s16), 1  ;;  %v1712_v50 = vld [vmem:[%s3227_s3 + $0x18] sm:$0xff]   ;;  %v1713_v51 = vld [vmem:[%s3227_s3 + $0x20] sm:$0xff]   ;;  %v1714_v52 = vld [vmem:[%s3227_s3 + $0x28] sm:$0xff]   ;;  %v1955_v56 = vshrl.u32 %v3229_v55, 7 }
  0x13   : > { %1562 = vmatprep.mubr.msk.bf16.mxu0 %vm1783_vm0, %v1782_v1  ;;  %1606 = vmatprep.mubr.msk.bf16.mxu1 %vm1783_vm0, %v1782_v1  ;;  %s1664_s25 = smul.u32 432, %s3419_s16  ;;  %v1715_v53 = vld [vmem:[%s3227_s3 + $0x30] sm:$0xff]   ;;  %v1716_v54 = vld [vmem:[%s3227_s3 + $0x38] sm:$0xff]   ;;  %v630_v58 = vld [vmem:[%s3226_s2] sm:$0xff]  ;;  %p214_p6 = scmp.lt.s32.totalorder %s211_s8, 47 }
  0x14   : > { %1622 = vmatprep.subr.bf16.mxu1 %v1709_v47  ;;  %v686_v57 = vsub.s32 1, %v1955_v56  ;;  %v634_v59 = vsub.s32 0, %v1955_v56  ;;  %v738_v60 = vsub.s32 2, %v1955_v56  ;;  %v842_v61 = vsub.s32 4, %v1955_v56  ;;  %s1665_s9 = smul.u32 48, %s3419_s16 }
  0x15   : > { %s210_s28 = scalar_lea.vmem %s3224_s0, %s1664_s25  ;;  %v790_v62 = vsub.s32 3, %v1955_v56  ;;  %v894_v63 = vsub.s32 5, %v1955_v56  ;;  %v998_v0 = vsub.s32 7, %v1955_v56  ;;  %vm538_vm2 = vcmp.lt.s32.totalorder %v1955_v56, 1  ;;  %s3421_s8 = smov (!%p214_p6, %s211_s8), 47 }
  0x16   : > { %s1857_s29 = scalar_lea.vmem %s210_s28, %s222_s24  ;;  %vm599_vm3 = vcmp.lt.s32.totalorder %v1955_v56, 7  ;;  %s217_s10 = sadd.s32 %s1665_s9, %s3421_s8 }
  0x17   : > { %v224_v2 = vld [vmem:[%s1857_s29] sm:$0xff]  ;;  %v225_v3 = vld [vmem:[%s1857_s29 + $0x8] sm:$0xff]  ;;  %v246_v4 = vld [vmem:[%s1857_s29 + $0xb0] sm:$0xff]  ;;  %s1496_s11 = sshll.u32 %s217_s10, 3 }
  0x18   : > { %v254_v5 = vpack.c.bf16 %v225_v3, %v224_v2  ;;  %v247_v6 = vld [vmem:[%s1857_s29 + $0xb8] sm:$0xff]  ;;  %v226_v8 = vld [vmem:[%s1857_s29 + $0x10] sm:$0xff]  ;;  %v248_v10 = vld [vmem:[%s1857_s29 + $0xc0] sm:$0xff]  ;;  %v1968_v3 = vrot.slane %v630_v58, %v686_v57  ;;  %s3087_s14 = scalar_lea.vmem %s3228_s4, %s1496_s11 }
  0x19   : > { %v265_v7 = vpack.c.bf16 %v247_v6, %v246_v4  ;;  %v227_v9 = vld [vmem:[%s1857_s29 + $0x18] sm:$0xff]  ;;  %v249_v11 = vld [vmem:[%s1857_s29 + $0xc8] sm:$0xff]  ;;  %v228_v14 = vld [vmem:[%s1857_s29 + $0x20] sm:$0xff]  ;;  %v1974_v6 = vrot.slane %v630_v58, %v634_v59 }
  0x1a   : > { %1563 = vmatmul.mubr.msk.bf16.vlgmr.msra.gmra.mrb[0].mxu0 %vm277_vm1, %v254_v5  ;;  %v255_v12 = vpack.c.bf16 %v227_v9, %v226_v8  ;;  %v266_v13 = vpack.c.bf16 %v249_v11, %v248_v10  ;;  %v229_v15 = vld [vmem:[%s1857_s29 + $0x28] sm:$0xff]  ;;  %v250_v16 = vld [vmem:[%s1857_s29 + $0xd0] sm:$0xff]  ;;  %v251_v17 = vld [vmem:[%s1857_s29 + $0xd8] sm:$0xff]  ;;  %v1978_v10 = vrot.slane %v630_v58, %v842_v61 }
  0x1b   : > { %1607 = vmatmul.mubr.msk.bf16.vlgmr.msra.gmra.mrb[0].mxu1 %vm277_vm1, %v265_v7  ;;  %1566 = vmatprep.mubr.msk.bf16.mxu0 %vm1783_vm0, %v1782_v1  ;;  %v256_v18 = vpack.c.bf16 %v229_v15, %v228_v14  ;;  %v267_v19 = vpack.c.bf16 %v251_v17, %v250_v16  ;;  %v230_v20 = vld [vmem:[%s1857_s29 + $0x30] sm:$0xff]  ;;  %v231_v21 = vld [vmem:[%s1857_s29 + $0x38] sm:$0xff]  ;;  %v252_v22 = vld [vmem:[%s1857_s29 + $0xe0] sm:$0xff]  ;;  %v1976_v7 = vrot.slane %v630_v58, %v738_v60 }
  0x1c   : > { %1610 = vmatprep.mubr.msk.bf16.mxu1 %vm1783_vm0, %v1782_v1  ;;  %v253_v23 = vld [vmem:[%s1857_s29 + $0xe8] sm:$0xff]  ;;  %v257_v24 = vpack.c.bf16 %v231_v21, %v230_v20  ;;  %v232_v26 = vld [vmem:[%s1857_s29 + $0x40] sm:$0xff]  ;;  %v234_v29 = vld [vmem:[%s1857_s29 + $0x50] sm:$0xff]  ;;  %1623 = vmatpush3.bf16.msra.mxu1 %v1709_v47  ;;  %v1984_v14 = vrot.slane %v630_v58, %v894_v63 }
  0x1d   : > { %v268_v25 = vpack.c.bf16 %v253_v23, %v252_v22  ;;  %v233_v27 = vld [vmem:[%s1857_s29 + $0x48] sm:$0xff]  ;;  %v235_v30 = vld [vmem:[%s1857_s29 + $0x58] sm:$0xff]  ;;  %v236_v32 = vld [vmem:[%s1857_s29 + $0x60] sm:$0xff]  ;;  %1624 = vmatprep.subr.bf16.mxu1 %v1710_v48 }
  0x1e   : > { %v258_v28 = vpack.c.bf16 %v233_v27, %v232_v26  ;;  %v259_v31 = vpack.c.bf16 %v235_v30, %v234_v29  ;;  %v237_v33 = vld [vmem:[%s1857_s29 + $0x68] sm:$0xff]  ;;  %v238_v35 = vld [vmem:[%s1857_s29 + $0x70] sm:$0xff]  ;;  %v239_v36 = vld [vmem:[%s1857_s29 + $0x78] sm:$0xff] }
  0x1f   : > { %v260_v34 = vpack.c.bf16 %v237_v33, %v236_v32  ;;  %v261_v37 = vpack.c.bf16 %v239_v36, %v238_v35  ;;  %v240_v38 = vld [vmem:[%s1857_s29 + $0x80] sm:$0xff]  ;;  %v241_v39 = vld [vmem:[%s1857_s29 + $0x88] sm:$0xff]  ;;  %v242_v41 = vld [vmem:[%s1857_s29 + $0x90] sm:$0xff] }
  0x20   : > { %v262_v40 = vpack.c.bf16 %v241_v39, %v240_v38  ;;  %v243_v42 = vld [vmem:[%s1857_s29 + $0x98] sm:$0xff]  ;;  %v244_v44 = vld [vmem:[%s1857_s29 + $0xa0] sm:$0xff]  ;;  %v245_v45 = vld [vmem:[%s1857_s29 + $0xa8] sm:$0xff]  ;;  %1625 = vmatpush3.bf16.msra.mxu1 %v1710_v48 }
  0x21   : > { %v263_v43 = vpack.c.bf16 %v243_v42, %v242_v41  ;;  %v264_v46 = vpack.c.bf16 %v245_v45, %v244_v44  ;;  %1626 = vmatprep.subr.bf16.mxu1 %v1711_v49  ;;  %v2032_v38 = vld [vmem:[%s3226_s2 + $0x8] ss:$0 sm:$0xff] }
  0x22   : > { %1567 = vmatmul.mubr.msk.bf16.gmra.mrb[4].mxu0 %vm277_vm1, %v255_v12 }
  0x23   : > { %1611 = vmatmul.mubr.msk.bf16.gmra.mrb[4].mxu1 %vm277_vm1, %v266_v13  ;;  %1570 = vmatprep.mubr.msk.bf16.mxu0 %vm1783_vm0, %v1782_v1  ;;  %v1982_v13 = vrot.slane %v630_v58, %v790_v62 }
  0x24   : > { %1614 = vmatprep.mubr.msk.bf16.mxu1 %vm1783_vm0, %v1782_v1  ;;  %1627 = vmatpush3.bf16.msra.mxu1 %v1711_v49 }
  0x25   : > { %1628 = vmatprep.subr.bf16.mxu1 %v1712_v50 }
  0x28   : > { %1629 = vmatpush3.bf16.msra.mxu1 %v1712_v50 }
  0x29   : > { %1630 = vmatprep.subr.bf16.mxu1 %v1713_v51 }
  0x2a   : > { %1571 = vmatmul.mubr.msk.bf16.gmra.mrb[8].mxu0 %vm277_vm1, %v256_v18 }
  0x2b   : > { %1615 = vmatmul.mubr.msk.bf16.gmra.mrb[8].mxu1 %vm277_vm1, %v267_v19  ;;  %1574 = vmatprep.mubr.msk.bf16.mxu0 %vm1783_vm0, %v1782_v1  ;;  %v1987_v19 = vrot.slane %v630_v58, %v998_v0 }
  0x2c   : > { %1618 = vmatprep.mubr.msk.bf16.mxu1 %vm1783_vm0, %v1782_v1  ;;  %1631 = vmatpush3.bf16.msra.mxu1 %v1713_v51 }
  0x2d   : > { %1632 = vmatprep.subr.bf16.mxu1 %v1714_v52 }
  0x30   : > { %1633 = vmatpush3.bf16.msra.mxu1 %v1714_v52 }
  0x31   : > { %1634 = vmatprep.subr.bf16.mxu1 %v1715_v53 }
  0x32   : > { %1575 = vmatmul.mubr.msk.bf16.gmra.mrb[12].mxu0 %vm277_vm1, %v257_v24 }
  0x33   : > { %1619 = vmatmul.mubr.msk.bf16.gmra.mrb[12].mxu1 %vm277_vm1, %v268_v25  ;;  %1578 = vmatprep.mubr.msk.bf16.mxu0 %vm1783_vm0, %v1782_v1 }
  0x34   : > { %1635 = vmatpush3.bf16.msra.mxu1 %v1715_v53 }
  0x35   : > { %1636 = vmatprep.subr.bf16.mxu1 %v1716_v54 }
  0x38   : > { %1637 = vmatpush3.bf16.msra.mxu1 %v1716_v54 }
  0x3a   : > { %1579 = vmatmul.mubr.msk.bf16.gmra.mrb[16].mxu0 %vm277_vm1, %v258_v28 }
  0x3b   : > { %1582 = vmatprep.mubr.msk.bf16.mxu0 %vm1783_vm0, %v1782_v1 }
  0x42   : > { %1583 = vmatmul.mubr.msk.bf16.gmra.mrb[20].mxu0 %vm277_vm1, %v259_v31 }
  0x43   : > { %1586 = vmatprep.mubr.msk.bf16.mxu0 %vm1783_vm0, %v1782_v1 }
  0x4a   : > { %1587 = vmatmul.mubr.msk.bf16.gmra.mrb[24].mxu0 %vm277_vm1, %v260_v34 }
  0x4b   : > { %1590 = vmatprep.mubr.msk.bf16.mxu0 %vm1783_vm0, %v1782_v1 }
  0x52   : > { %1591 = vmatmul.mubr.msk.bf16.gmra.mrb[28].mxu0 %vm277_vm1, %v261_v37 }
  0x53   : > { %1594 = vmatprep.mubr.msk.bf16.mxu0 %vm1783_vm0, %v1782_v1 }
  0x5a   : > { %1595 = vmatmul.mubr.msk.bf16.gmra.mrb[32].mxu0 %vm277_vm1, %v262_v40 }
  0x5b   : > { %1598 = vmatprep.mubr.msk.bf16.mxu0 %vm1783_vm0, %v1782_v1 }
  0x62   : > { %1599 = vmatmul.mubr.msk.bf16.gmra.mrb[36].mxu0 %vm277_vm1, %v263_v43 }
  0x63   : > { %1602 = vmatprep.mubr.msk.bf16.mxu0 %vm1783_vm0, %v1782_v1  ;;  %v946_v1 = vsub.s32 6, %v1955_v56 }
  0x65   : > { %v1989_v20 = vrot.slane %v630_v58, %v946_v1 }
  0x6a   : > { %1603 = vmatmul.mubr.msk.bf16.gmra.mrb[40].mxu0 %vm277_vm1, %v264_v46 }
  0xed   : > { %v357_v2 = vpop.f32.mrb[0].mxu0 }
  0xee   : > { %v1971_v4 = vmax.f32 %v357_v2, 0.0  ;;  %v1564_v5 = vpop.f32.mrb[1].mxu0  ;;  %v445_v8 = vpop.f32.mrb[0].mxu1 }
  0xef   : > { %v360_v9 = vpop.f32.mrb[2].mxu0  ;;  %v1980_v11 = vmax.f32 %v445_v8, 0.0  ;;  %v1608_v12 = vpop.f32.mrb[1].mxu1 }
  0xf0   : > { %v3237_v15 = vrot.slane %v1971_v4, 7  ;;  %v477_v16 = vmax.f32 %v360_v9, 0.0  ;;  %v1565_v17 = vpop.f32.mrb[3].mxu0  ;;  %v448_v18 = vpop.f32.mrb[2].mxu1  ;;  %v3236_v21 = vrot.slane %v1971_v4, 1  ;;  %v1998_v26 = vmul.f32 %v1968_v3, %v1971_v4 }
  0xf1   : > { %3258 = vst [vmem:[#allocation2_spill] sm:$0xff] %v1980_v11  ;;  %v3232_v22 = vrot.slane %v1980_v11, 7  ;;  %v3233_v23 = vrot.slane %v1980_v11, 1  ;;  %v1994_v24 = vmax.f32 %v448_v18, 0.0  ;;  %v1609_v25 = vpop.f32.mrb[3].mxu1  ;;  %v2002_v29 = vmul.f32 %v1978_v10, %v1980_v11 }
  0xf2   : > { %v507_v27 = vrot.slane %v477_v16, 7  ;;  %v570_v28 = vrot.slane %v477_v16, 1  ;;  %v2005_v30 = vmul.f32 %v1968_v3, %v477_v16  ;;  %v2011_v33 = vmul.f32 %v1968_v3, %v1980_v11 }
  0xf3   : > { %3259 = vst [vmem:[#allocation3_spill] sm:$0xff] %v1994_v24  ;;  %3260 = vst [vmem:[#allocation4_spill] sm:$0xff] %v2002_v29  ;;  %v3231_v31 = vrot.slane %v1994_v24, 7  ;;  %v592_v32 = vrot.slane %v1994_v24, 1  ;;  %v2023_v36 = vmul.f32 %v1978_v10, %v1994_v24  ;;  %v2027_v37 = vmul.f32 %v1968_v3, %v1994_v24 }
  0xf4   : > { %v567_v34 = vsel %vm538_vm2, %v3237_v15, %v507_v27  ;;  %v628_v35 = vsel %vm599_vm3, %v3236_v21, %v570_v28  ;;  %v2046_v42 = vmul.f32 %v1987_v19, %v1980_v11  ;;  %v2050_v43 = vmul.f32 %v1987_v19, %v1994_v24 }
  0xf5   : > { %3261 = vst [vmem:[#allocation5_spill] sm:$0xff] %v2023_v36  ;;  %v365_v39 = vpop.f32.mrb[4].mxu0  ;;  %v545_v40 = vsel %vm538_vm2, %v3232_v22, %v3231_v31  ;;  %v606_v41 = vsel %vm599_vm3, %v3233_v23, %v592_v32  ;;  %v637_v44 = vmul.f32 %v1974_v6, %v567_v34  ;;  %v2054_v45 = vmul.f32 %v1976_v7, %v628_v35 }
  0xf6   : > { %3262 = vst [vmem:[#allocation6_spill] sm:$0xff] %v2046_v42  ;;  %3263 = vst [vmem:[#allocation7_spill] sm:$0xff] %v2050_v43  ;;  %v478_v46 = vmax.f32 %v365_v39, 0.0  ;;  %v1568_v47 = vpop.f32.mrb[5].mxu0  ;;  %v453_v48 = vpop.f32.mrb[4].mxu1  ;;  %v659_v49 = vmul.f32 %v1974_v6, %v545_v40  ;;  %v2060_v53 = vmul.f32 %v1976_v7, %v606_v41  ;;  %v2063_v54 = vmul.f32 %v1989_v20, %v545_v40 }
  0xf7   : > { %v368_v50 = vpop.f32.mrb[6].mxu0  ;;  %v2057_v51 = vmax.f32 %v453_v48, 0.0  ;;  %v1612_v52 = vpop.f32.mrb[5].mxu1  ;;  %v2066_v57 = vmul.f32 %v2032_v38, %v606_v41  ;;  %v2071_v63 = vmul.f32 %v1984_v14, %v606_v41  ;;  %v2079_v8 = vmul.f32 %v1982_v13, %v545_v40 }
  0xf8   : > { %3265 = vst [vmem:[#allocation9_spill] sm:$0xff] %v2060_v53  ;;  %3266 = vst [vmem:[#allocation10_spill] sm:$0xff] %v2063_v54  ;;  %v508_v58 = vrot.slane %v478_v46, 7  ;;  %v571_v59 = vrot.slane %v478_v46, 1  ;;  %v2068_v60 = vmax.f32 %v368_v50, 0.0  ;;  %v1569_v61 = vpop.f32.mrb[7].mxu0  ;;  %v2074_v0 = vmul.f32 %v1968_v3, %v478_v46 }
  0xf9   : > { %3264 = vst [vmem:[#allocation8_spill] sm:$0xff] %v2057_v51  ;;  %3267 = vst [vmem:[#allocation11_spill] sm:$0xff] %v2066_v57  ;;  %v456_v62 = vpop.f32.mrb[6].mxu1  ;;  %v3235_v1 = vrot.slane %v2057_v51, 7  ;;  %v3230_v2 = vrot.slane %v2057_v51, 1  ;;  %v2091_v34 = vmul.f32 %v1978_v10, %v2057_v51  ;;  %v2095_v35 = vmul.f32 %v1987_v19, %v2057_v51 }
  0xfa   : > { %3268 = vst [vmem:[#allocation12_spill] sm:$0xff] %v2071_v63  ;;  %v1613_v5 = vpop.f32.mrb[7].mxu1  ;;  %3269 = vst [vmem:[#allocation13_spill] sm:$0xff] %v2079_v8  ;;  %v566_v9 = vsel %vm538_vm2, %v507_v27, %v508_v58  ;;  %v627_v12 = vsel %vm599_vm3, %v570_v28, %v571_v59  ;;  %v509_v16 = vrot.slane %v2068_v60, 7  ;;  %v3234_v17 = vrot.slane %v2068_v60, 1 }
  0xfb   : > { %v638_v18 = vmul.f32 %v1974_v6, %v566_v9  ;;  %v741_v25 = vmul.f32 %v1976_v7, %v627_v12  ;;  %3270 = vst [vmem:[#allocation14_spill] sm:$0xff] %v2091_v34  ;;  %3271 = vst [vmem:[#allocation15_spill] sm:$0xff] %v2095_v35  ;;  %v2109_v39 = vsel %vm599_vm3, %v592_v32, %v3230_v2  ;;  %v2111_v40 = vmax.f32 %v456_v62, 0.0 }
  0xfc   : > { %v2099_v27 = vsel %vm538_vm2, %v508_v58, %v509_v16  ;;  %v626_v28 = vsel %vm599_vm3, %v571_v59, %v3234_v17  ;;  %3272 = vst [vmem:[#allocation16_spill] sm:$0xff] %v2109_v39  ;;  %v2115_v41 = vmul.f32 %v1968_v3, %v2068_v60  ;;  %v763_v50 = vmul.f32 %v1976_v7, %v2109_v39 }
  0xfd   : > { %3273 = vst [vmem:[#allocation17_spill] sm:$0xff] %v2111_v40  ;;  %v742_v46 = vmul.f32 %v1976_v7, %v626_v28  ;;  %v373_v47 = vpop.f32.mrb[8].mxu0  ;;  %v765_v48 = vadd.f32 %v741_v25, %v637_v44  ;;  %v2122_v52 = vmul.f32 %v1974_v6, %v2099_v27  ;;  %v2126_v32 = vmul.f32 %v1978_v10, %v2068_v60 }
  0xfe   : > { %v2128_v58 = vmax.f32 %v373_v47, 0.0  ;;  %v1572_v59 = vpop.f32.mrb[9].mxu0  ;;  %v531_v61 = vrot.slane %v2111_v40, 7  ;;  %v461_v62 = vpop.f32.mrb[8].mxu1  ;;  %v3239_v44 = vrot.slane %v2111_v40, 1  ;;  %v787_v25 = vadd.f32 %v763_v50, %v659_v49 }
  0xff   : > { %v376_v5 = vpop.f32.mrb[10].mxu0  ;;  %v766_v9 = vadd.f32 %v742_v46, %v638_v18  ;;  %v502_v12 = vmax.f32 %v461_v62, 0.0  ;;  %v1616_v28 = vpop.f32.mrb[9].mxu1  ;;  %v2138_v47 = vmul.f32 %v1987_v19, %v2111_v40 }
 0x100   : > { %v510_v55 = vrot.slane %v2128_v58, 7  ;;  %v845_v31 = vmul.f32 %v1978_v10, %v2128_v58  ;;  %v1573_v59 = vpop.f32.mrb[11].mxu0  ;;  %v464_v22 = vpop.f32.mrb[10].mxu1  ;;  %v2140_v23 = vmax.f32 %v376_v5, 0.0  ;;  %v2146_v49 = vsel %vm538_vm2, %v3235_v1, %v531_v61 }
 0x101   : > { %3274 = vst [vmem:[#allocation18_spill] sm:$0xff] %v2138_v47  ;;  %3275 = vst [vmem:[#allocation19_spill] sm:$0xff] %v2146_v49  ;;  %v532_v18 = vrot.slane %v502_v12, 7  ;;  %v595_v46 = vrot.slane %v502_v12, 1  ;;  %v1617_v50 = vpop.f32.mrb[11].mxu1  ;;  %v2154_v28 = vmul.f32 %v1968_v3, %v2128_v58  ;;  %v867_v5 = vmul.f32 %v1978_v10, %v502_v12 }
 0x102   : > { %v2150_v62 = vsel %vm538_vm2, %v509_v16, %v510_v55  ;;  %v2156_v59 = vadd.f32 %v845_v31, %v765_v48  ;;  %v3238_v1 = vrot.slane %v2140_v23, 7  ;;  %v2166_v2 = vmul.f32 %v1987_v19, %v502_v12 }
 0x103   : > { %v2161_v17 = vmul.f32 %v1974_v6, %v2150_v62  ;;  %v846_v16 = vmul.f32 %v1978_v10, %v2140_v23  ;;  %v2172_v31 = vsel %vm538_vm2, %v531_v61, %v532_v18  ;;  %v2174_v48 = vadd.f32 %v867_v5, %v787_v25 }
 0x104   : > { %3276 = vst [vmem:[#allocation20_spill] sm:$0xff] %v2166_v2  ;;  %3277 = vst [vmem:[#allocation21_spill] sm:$0xff] %v2172_v31  ;;  %v503_v21 = vmax.f32 %v464_v22, 0.0  ;;  %v563_v15 = vsel %vm538_vm2, %v510_v55, %v3238_v1  ;;  %v2182_v50 = vmul.f32 %v1968_v3, %v2140_v23  ;;  %v2188_v53 = vsel %vm599_vm3, %v3239_v44, %v595_v46 }
 0x105   : > { %3278 = vst [vmem:[#allocation22_spill] sm:$0xff] %v2174_v48  ;;  %v381_v12 = vpop.f32.mrb[12].mxu0  ;;  %3279 = vst [vmem:[#allocation23_spill] sm:$0xff] %v2188_v53  ;;  %v814_v61 = vmul.f32 %v1982_v13, %v2146_v49  ;;  %v794_v22 = vmul.f32 %v1982_v13, %v563_v15  ;;  %v2193_v25 = vadd.f32 %v846_v16, %v766_v9  ;;  %v3302_v51 = vrot.slane %v2140_v23, 1 }
 0x106   : > { %v533_v5 = vrot.slane %v503_v21, 7  ;;  %v469_v55 = vpop.f32.mrb[12].mxu1  ;;  %v1576_v1 = vpop.f32.mrb[13].mxu0  ;;  %v815_v48 = vmul.f32 %v1982_v13, %v2172_v31  ;;  %v2198_v2 = vmul.f32 %v1974_v6, %v563_v15  ;;  %v596_v34 = vrot.slane %v503_v21, 1 }
 0x107   : > { %v2200_v36 = vmax.f32 %v381_v12, 0.0  ;;  %v504_v44 = vmax.f32 %v469_v55, 0.0  ;;  %v1620_v8 = vpop.f32.mrb[13].mxu1  ;;  %v384_v47 = vpop.f32.mrb[14].mxu0  ;;  %v818_v35 = vadd.f32 %v794_v22, %v2074_v0  ;;  %v838_v16 = vadd.f32 %v814_v61, %v2011_v33 }
 0x108   : > { %v541_v9 = vsel %vm538_vm2, %v532_v18, %v533_v5  ;;  %v918_v1 = vmul.f32 %v1984_v14, %v2188_v53  ;;  %v472_v31 = vpop.f32.mrb[14].mxu1  ;;  %v1577_v49 = vpop.f32.mrb[15].mxu0  ;;  %v2210_v15 = vsel %vm599_vm3, %v595_v46, %v596_v34  ;;  %v2216_v8 = vmul.f32 %v1987_v19, %v503_v21 }
 0x109   : > { %3280 = vst [vmem:[#allocation24_spill] sm:$0xff] %v2210_v15  ;;  %v2213_v12 = vmul.f32 %v1989_v20, %v541_v9  ;;  %v3244_v0 = vrot.slane %v2200_v36, 1  ;;  %v1621_v18 = vpop.f32.mrb[15].mxu1  ;;  %v919_v33 = vmul.f32 %v1984_v14, %v2210_v15  ;;  %v512_v61 = vrot.slane %v2200_v36, 7 }
 0x10a   : > { %3282 = vst [vmem:[#allocation26_spill] sm:$0xff] %v2216_v8  ;;  %v2224_v49 = vmul.f32 %v1968_v3, %v2200_v36  ;;  %v534_v46 = vrot.slane %v504_v44, 7  ;;  %v3284_v22 = vrot.slane %v2140_v23, 1  ;;  %v597_v55 = vrot.slane %v504_v44, 1 }
 0x10b   : > { %3281 = vst [vmem:[#allocation25_spill] sm:$0xff] %v2213_v12  ;;  %v942_v9 = vadd.f32 %v918_v1, %v838_v16  ;;  %v1022_v18 = vmul.f32 %v1987_v19, %v504_v44  ;;  %v2241_v15 = vmax.f32 %v384_v47, 0.0  ;;  %v505_v53 = vmax.f32 %v472_v31, 0.0 }
 0x10c   : > { %3283 = vst [vmem:[#allocation27_spill] sm:$0xff] %v2224_v49  ;;  %v2232_v21 = vsel %vm599_vm3, %v3284_v22, %v3244_v0  ;;  %v2239_v12 = vsel %vm538_vm2, %v533_v5, %v534_v46  ;;  %v2245_v63 = vmul.f32 %v1978_v10, %v2200_v36  ;;  %v2249_v22 = vsel %vm599_vm3, %v596_v34, %v597_v55 }
 0x10d   : > { %v898_v8 = vmul.f32 %v1984_v14, %v2232_v21  ;;  %3285 = vst [vmem:[#allocation28_spill] sm:$0xff] %v2239_v12  ;;  %3286 = vst [vmem:[#allocation29_spill] sm:$0xff] %v2249_v22  ;;  %v2251_v16 = vadd.f32 %v1022_v18, %v942_v9  ;;  %v839_v44 = vadd.f32 %v815_v48, %v2027_v37  ;;  %v389_v1 = vpop.f32.mrb[16].mxu0  ;;  %v513_v0 = vrot.slane %v2241_v15, 7 }
 0x10e   : > { %v576_v5 = vrot.slane %v2241_v15, 1  ;;  %v2258_v47 = vmul.f32 %v1968_v3, %v2241_v15  ;;  %v2262_v31 = vmul.f32 %v1978_v10, %v2241_v15  ;;  %v1580_v12 = vpop.f32.mrb[17].mxu0  ;;  %v535_v34 = vrot.slane %v505_v53, 7 }
 0x10f   : > { %3287 = vst [vmem:[#allocation30_spill] sm:$0xff] %v2251_v16  ;;  %v598_v22 = vrot.slane %v505_v53, 1  ;;  %v943_v9 = vadd.f32 %v919_v33, %v839_v44  ;;  %v1023_v18 = vmul.f32 %v1987_v19, %v505_v53  ;;  %v392_v37 = vpop.f32.mrb[18].mxu0  ;;  %v484_v48 = vmax.f32 %v389_v1, 0.0 }
 0x110   : > { %3288 = vst [vmem:[#allocation31_spill] sm:$0xff] %v2258_v47  ;;  %v922_v16 = vadd.f32 %v898_v8, %v818_v35  ;;  %v2265_v29 = vmax.f32 %v392_v37, 0.0  ;;  %v1581_v57 = vpop.f32.mrb[19].mxu0  ;;  %v2269_v43 = vsel %vm538_vm2, %v512_v61, %v513_v0  ;;  %v539_v42 = vsel %vm538_vm2, %v534_v46, %v535_v34 }
 0x111   : > { %v3289_v12 = vrot.slane %v1971_v4, 7  ;;  %v2279_v53 = vsel %vm599_vm3, %v597_v55, %v598_v22  ;;  %v3291_v35 = vrot.slane %v1971_v4, 1  ;;  %v2289_v44 = vmul.f32 %v1989_v20, %v539_v42 }
 0x112   : > { %3290 = vst [vmem:[#allocation32_spill] sm:$0xff] %v2279_v53  ;;  %v2291_v46 = vadd.f32 %v1023_v18, %v943_v9  ;;  %v514_v1 = vrot.slane %v484_v48, 7  ;;  %v577_v37 = vrot.slane %v484_v48, 1  ;;  %v2297_v55 = vmul.f32 %v1978_v10, %v484_v48 }
 0x113   : > { %v568_v33 = vsel %vm538_vm2, %v535_v34, %v3289_v12  ;;  %v2285_v57 = vsel %vm599_vm3, %v598_v22, %v3291_v35  ;;  %3293 = vst [vmem:[#allocation34_spill] sm:$0xff] %v2289_v44  ;;  %v2294_v34 = vmul.f32 %v1968_v3, %v484_v48  ;;  %v1002_v4 = vmul.f32 %v1987_v19, %v484_v48 }
 0x114   : > { %3292 = vst [vmem:[#allocation33_spill] sm:$0xff] %v2285_v57  ;;  %v636_v8 = vmul.f32 %v1974_v6, %v568_v33  ;;  %3294 = vst [vmem:[#allocation35_spill] sm:$0xff] %v2291_v46  ;;  %v2303_v12 = vsel %vm538_vm2, %v513_v0, %v514_v1  ;;  %v3245_v42 = vrot.slane %v2265_v29, 7  ;;  %v578_v9 = vrot.slane %v2265_v29, 1 }
 0x115   : > { %3295 = vst [vmem:[#allocation36_spill] sm:$0xff] %v2294_v34  ;;  %v2309_v18 = vmul.f32 %v1989_v20, %v2303_v12  ;;  %v2311_v33 = vadd.f32 %v1002_v4, %v922_v16  ;;  %v2315_v35 = vmul.f32 %v1968_v3, %v2265_v29  ;;  %v397_v0 = vpop.f32.mrb[20].mxu0  ;;  %v2333_v16 = vmul.f32 %v1987_v19, %v2265_v29 }
 0x116   : > { %v764_v22 = vadd.f32 %v2054_v45, %v636_v8  ;;  %v2319_v45 = vmul.f32 %v1978_v10, %v2265_v29  ;;  %v2325_v48 = vsel %vm538_vm2, %v514_v1, %v3245_v42  ;;  %v2329_v8 = vsel %vm599_vm3, %v577_v37, %v578_v9  ;;  %v1584_v46 = vpop.f32.mrb[21].mxu0 }
 0x117   : > { %3296 = vst [vmem:[#allocation37_spill] sm:$0xff] %v2315_v35  ;;  %v2335_v4 = vmax.f32 %v397_v0, 0.0  ;;  %v2339_v53 = vmul.f32 %v1989_v20, %v2325_v48  ;;  %v400_v57 = vpop.f32.mrb[22].mxu0  ;;  %v3298_v44 = vrot.slane %v2140_v23, 7  ;;  %v2349_v42 = vsel %vm599_vm3, %v576_v5, %v577_v37 }
 0x118   : > { %3297 = vst [vmem:[#allocation38_spill] sm:$0xff] %v2319_v45  ;;  %v3299_v54 = vrot.slane %v2200_v36, 1  ;;  %v2365_v37 = vmax.f32 %v400_v57, 0.0  ;;  %v3303_v39 = vrot.slane %v2128_v58, 1  ;;  %v3305_v0 = vrot.slane %v2068_v60, 1 }
 0x119   : > { %v2345_v1 = vsel %vm538_vm2, %v3298_v44, %v512_v61  ;;  %v2359_v24 = vmul.f32 %v1968_v3, %v2335_v4  ;;  %v2363_v61 = vmul.f32 %v1978_v10, %v2335_v4  ;;  %v1585_v44 = vpop.f32.mrb[23].mxu0  ;;  %v3306_v57 = vrot.slane %v2335_v4, 1 }
 0x11a   : > { %v622_v46 = vsel %vm599_vm3, %v3299_v54, %v576_v5  ;;  %v624_v54 = vsel %vm599_vm3, %v3303_v39, %v3302_v51  ;;  %v3304_v5 = vmov %v3303_v39  ;;  %v2394_v60 = vmul.f32 %v1976_v7, %v2349_v42 }
 0x11b   : > { %3300 = vst [vmem:[#allocation39_spill] sm:$0xff] %v2359_v24  ;;  %3301 = vst [vmem:[#allocation40_spill] sm:$0xff] %v2363_v61  ;;  %v625_v40 = vsel %vm599_vm3, %v3305_v0, %v3304_v5  ;;  %v2380_v11 = vmul.f32 %v1976_v7, %v622_v46  ;;  %v2386_v23 = vsel %vm599_vm3, %v578_v9, %v3306_v57 }
 0x11c   : > { %v743_v44 = vmul.f32 %v1976_v7, %v625_v40  ;;  %v2390_v51 = vmul.f32 %v1976_v7, %v624_v54  ;;  %v2400_v0 = vmul.f32 %v1968_v3, %v2365_v37  ;;  %v2404_v9 = vmul.f32 %v1978_v10, %v2365_v37 }
 0x11d   : > { %v792_v57 = vmul.f32 %v1982_v13, %v2099_v27  ;;  %v793_v24 = vmul.f32 %v1982_v13, %v2150_v62  ;;  %v795_v39 = vmul.f32 %v1982_v13, %v2345_v1  ;;  %v868_v58 = vadd.f32 %v2126_v32, %v764_v22 }
 0x11e   : > { %3307 = vst [vmem:[#allocation41_spill] sm:$0xff] %v2400_v0  ;;  %3308 = vst [vmem:[#allocation42_spill] sm:$0xff] %v2404_v9  ;;  %v767_v5 = vadd.f32 %v743_v44, %v2122_v52  ;;  %v896_v35 = vmul.f32 %v1984_v14, %v625_v40  ;;  %v897_v0 = vmul.f32 %v1984_v14, %v624_v54  ;;  %v405_v9 = vpop.f32.mrb[24].mxu0 }
 0x11f   : > { %v899_v34 = vmul.f32 %v1984_v14, %v622_v46  ;;  %v816_v52 = vadd.f32 %v792_v57, %v1998_v26  ;;  %v817_v44 = vadd.f32 %v793_v24, %v2005_v30  ;;  %v819_v27 = vadd.f32 %v795_v39, %v2115_v41  ;;  %v1588_v61 = vpop.f32.mrb[25].mxu0 }
 0x120   : > { %v871_v62 = vadd.f32 %v2245_v63, %v767_v5  ;;  %v948_v45 = vmul.f32 %v1989_v20, %v2345_v1  ;;  %v949_v40 = vmul.f32 %v1989_v20, %v2269_v43  ;;  %v1000_v32 = vmul.f32 %v1987_v19, %v2200_v36  ;;  %v408_v26 = vpop.f32.mrb[26].mxu0 }
 0x121   : > { %v1001_v22 = vmul.f32 %v1987_v19, %v2241_v15  ;;  %v920_v54 = vadd.f32 %v896_v35, %v816_v52  ;;  %v921_v24 = vadd.f32 %v897_v0, %v817_v44  ;;  %v923_v30 = vadd.f32 %v899_v34, %v819_v27  ;;  %v1589_v63 = vpop.f32.mrb[27].mxu0 }
 0x122   : > { %v1052_v41 = vmul.f32 %v2032_v38, %v622_v46  ;;  %v972_v61 = vadd.f32 %v948_v45, %v868_v58  ;;  %v973_v39 = vadd.f32 %v949_v40, %v2156_v59  ;;  %v1053_v5 = vmul.f32 %v2032_v38, %v2349_v42 }
 0x123   : > { %v2433_v57 = vmax.f32 %v405_v9, 0.0  ;;  %v1024_v47 = vadd.f32 %v1000_v32, %v920_v54  ;;  %v1025_v36 = vadd.f32 %v1001_v22, %v921_v24  ;;  %v2435_v49 = vmax.f32 %v408_v26, 0.0 }
 0x124   : > { %v974_v15 = vadd.f32 %v2309_v18, %v2193_v25  ;;  %v1076_v35 = vadd.f32 %v1052_v41, %v972_v61  ;;  %v1077_v34 = vadd.f32 %v1053_v5, %v973_v39  ;;  %v975_v40 = vadd.f32 %v2339_v53, %v871_v62 }
 0x125   : > { %v518_v46 = vrot.slane %v2433_v57, 7  ;;  %v3255_v45 = vrot.slane %v2433_v57, 1  ;;  %v2443_v59 = vmul.f32 %v1968_v3, %v2433_v57  ;;  %v2447_v58 = vmul.f32 %v1978_v10, %v2433_v57  ;;  %v413_v27 = vpop.f32.mrb[28].mxu0 }
 0x126   : > { %v3257_v0 = vrot.slane %v2435_v49, 7  ;;  %v582_v9 = vrot.slane %v2435_v49, 1  ;;  %v1100_v52 = vadd.f32 %v1076_v35, %v1024_v47  ;;  %v1101_v25 = vadd.f32 %v1077_v34, %v1025_v36  ;;  %v1592_v26 = vpop.f32.mrb[29].mxu0 }
 0x127   : > { %v2453_v18 = vmul.f32 %v1968_v3, %v2435_v49  ;;  %v2457_v44 = vmul.f32 %v1978_v10, %v2435_v49  ;;  %v1027_v32 = vadd.f32 %v2333_v16, %v923_v30  ;;  %v1054_v22 = vmul.f32 %v2032_v38, %v2329_v8  ;;  %v416_v41 = vpop.f32.mrb[30].mxu0 }
 0x128   : > { %v1055_v47 = vmul.f32 %v2032_v38, %v2386_v23  ;;  %v1124_v54 = vpack.c.bf16 %v1101_v25, %v1100_v52  ;;  %v2465_v24 = vmax.f32 %v413_v27, 0.0  ;;  %v3309_v63 = vrot.slane %v2365_v37, 7  ;;  %v1593_v35 = vpop.f32.mrb[31].mxu0 }
 0x129   : > { %v3310_v61 = vrot.slane %v2335_v4, 7  ;;  %v3312_v62 = vrot.slane %v2265_v29, 7  ;;  %v1078_v39 = vadd.f32 %v1054_v22, %v974_v15  ;;  %v2483_v36 = vmax.f32 %v416_v41, 0.0 }
 0x12a   : > { %v1079_v5 = vadd.f32 %v1055_v47, %v975_v40  ;;  %v3313_v34 = vrot.slane %v2365_v37, 1  ;;  %1638 = vmatprep.mubr.bf16.mxu1 %v1124_v54  ;;  %v3256_v25 = vrot.slane %v2465_v24, 1  ;;  %v2497_v15 = vmul.f32 %v1968_v3, %v2465_v24 }
 0x12b   : > { %v2473_v53 = vsel %vm538_vm2, %v3310_v61, %v3309_v63  ;;  %v3311_v16 = vmov %v3310_v61  ;;  %v2501_v27 = vmul.f32 %v1978_v10, %v2465_v24  ;;  %v1102_v40 = vadd.f32 %v1078_v39, %v2311_v33 }
 0x12c   : > { %v2481_v30 = vsel %vm538_vm2, %v3312_v62, %v3311_v16  ;;  %v2491_v52 = vsel %vm599_vm3, %v3313_v34, %v3255_v45  ;;  %v1103_v22 = vadd.f32 %v1079_v5, %v1027_v32  ;;  %v2508_v54 = vmul.f32 %v1968_v3, %v2483_v36 }
 0x12d   : > { %v2512_v41 = vmul.f32 %v1978_v10, %v2483_v36  ;;  %v3314_v63 = vmov %v3313_v34  ;;  %v3315_v61 = vrot.slane %v2335_v4, 1  ;;  %v745_v32 = vmul.f32 %v1976_v7, %v2232_v21 }
 0x12e   : > { %v1125_v16 = vpack.c.bf16 %v1103_v22, %v1102_v40  ;;  %v2530_v39 = vmul.f32 %v1976_v7, %v2491_v52  ;;  %v768_v5 = vadd.f32 %v2390_v51, %v2161_v17  ;;  %v796_v34 = vmul.f32 %v1982_v13, %v2269_v43  ;;  %v421_v22 = vpop.f32.mrb[32].mxu0 }
 0x12f   : > { %v2520_v33 = vsel %vm599_vm3, %v3315_v61, %v3314_v63  ;;  %v769_v35 = vadd.f32 %v745_v32, %v2198_v2  ;;  %v797_v21 = vmul.f32 %v1982_v13, %v2303_v12  ;;  %v900_v40 = vmul.f32 %v1984_v14, %v2349_v42  ;;  %v1596_v51 = vpop.f32.mrb[33].mxu0 }
 0x130   : > { %v2526_v62 = vmul.f32 %v1976_v7, %v2520_v33  ;;  %1639 = vmatmul.mubr.bf16.vlgmr.msra.gmra.mrb[16].mxu1 %v1125_v16  ;;  %v872_v63 = vadd.f32 %v2262_v31, %v768_v5  ;;  %v901_v61 = vmul.f32 %v1984_v14, %v2329_v8  ;;  %v952_v17 = vmul.f32 %v1989_v20, %v2481_v30  ;;  %v424_v31 = vpop.f32.mrb[34].mxu0 }
 0x131   : > { %v953_v2 = vmul.f32 %v1989_v20, %v2473_v53  ;;  %v820_v32 = vadd.f32 %v796_v34, %v2154_v28  ;;  %v821_v26 = vadd.f32 %v797_v21, %v2182_v50  ;;  %v873_v42 = vadd.f32 %v2297_v55, %v769_v35  ;;  %v1597_v45 = vpop.f32.mrb[35].mxu0 }
 0x132   : > { %v1004_v16 = vmul.f32 %v1987_v19, %v2335_v4  ;;  %v976_v5 = vadd.f32 %v952_v17, %v872_v63  ;;  %v1005_v29 = vmul.f32 %v1987_v19, %v2365_v37  ;;  %v1056_v47 = vmul.f32 %v2032_v38, %v2520_v33 }
 0x133   : > { %v1057_v51 = vmul.f32 %v2032_v38, %v2491_v52  ;;  %v924_v28 = vadd.f32 %v900_v40, %v820_v32  ;;  %v925_v34 = vadd.f32 %v901_v61, %v821_v26  ;;  %v977_v50 = vadd.f32 %v953_v2, %v873_v42  ;;  %v3323_v61 = vld [vmem:[#allocation38_spill] sm:$0xff] }
 0x134   : > { %v2559_v21 = vmax.f32 %v421_v22, 0.0  ;;  %v1080_v55 = vadd.f32 %v1056_v47, %v976_v5  ;;  %v2561_v35 = vmax.f32 %v424_v31, 0.0  ;;  %v2569_v4 = vsel %vm538_vm2, %v518_v46, %v3257_v0 }
 0x135   : > { %v3316_v45 = vrot.slane %v2365_v37, 7  ;;  %v1028_v40 = vadd.f32 %v1004_v16, %v924_v28  ;;  %v1029_v47 = vadd.f32 %v1005_v29, %v925_v34  ;;  %v1081_v22 = vadd.f32 %v1057_v51, %v977_v50  ;;  %v429_v16 = vpop.f32.mrb[36].mxu0  ;;  %v3322_v37 = vld [vmem:[#allocation31_spill] sm:$0xff] }
 0x136   : > { %v2583_v17 = vmul.f32 %v1968_v3, %v2559_v21  ;;  %v2587_v2 = vmul.f32 %v1978_v10, %v2559_v21  ;;  %v2593_v29 = vmul.f32 %v1968_v3, %v2561_v35  ;;  %v2597_v31 = vmul.f32 %v1978_v10, %v2561_v35  ;;  %v1600_v50 = vpop.f32.mrb[37].mxu0 }
 0x137   : > { %v2577_v26 = vsel %vm538_vm2, %v3316_v45, %v518_v46  ;;  %v1104_v32 = vadd.f32 %v1080_v55, %v1028_v40  ;;  %v1105_v46 = vadd.f32 %v1081_v22, %v1029_v47  ;;  %v2605_v5 = vsel %vm599_vm3, %v582_v9, %v3256_v25  ;;  %v432_v22 = vpop.f32.mrb[38].mxu0 }
 0x138   : > { %3317 = vst [vmem:[#allocation43_spill] sm:$0xff] %v2583_v17  ;;  %3318 = vst [vmem:[#allocation44_spill] sm:$0xff] %v2593_v29  ;;  %v3320_v51 = vrot.slane %v2433_v57, 1  ;;  %v642_v34 = vmul.f32 %v1974_v6, %v2345_v1  ;;  %v643_v45 = vmul.f32 %v1974_v6, %v2269_v43  ;;  %v2625_v47 = vmul.f32 %v1976_v7, %v2605_v5 }
 0x139   : > { %3319 = vst [vmem:[#allocation45_spill] sm:$0xff] %v2597_v31  ;;  %v1126_v55 = vpack.c.bf16 %v1105_v46, %v1104_v32  ;;  %v799_v1 = vmul.f32 %v1982_v13, %v2481_v30  ;;  %v902_v43 = vmul.f32 %v1984_v14, %v2386_v23  ;;  %v1601_v32 = vpop.f32.mrb[39].mxu0  ;;  %v903_v50 = vmul.f32 %v1984_v14, %v2520_v33 }
 0x13a   : > { %v2613_v28 = vsel %vm599_vm3, %v3320_v51, %v582_v9  ;;  %v770_v9 = vadd.f32 %v2380_v11, %v642_v34  ;;  %v798_v51 = vmul.f32 %v1982_v13, %v2325_v48  ;;  %v771_v46 = vadd.f32 %v2394_v60, %v643_v45  ;;  %v3321_v34 = vld [vmem:[#allocation27_spill] sm:$0xff]  ;;  %v3324_v32 = vld [vmem:[#allocation40_spill] sm:$0xff] }
 0x13b   : > { %v2621_v40 = vmul.f32 %v1976_v7, %v2613_v28  ;;  %1642 = vmatprep.mubr.bf16.mxu1 %v1126_v55  ;;  %v954_v42 = vmul.f32 %v1989_v20, %v2577_v26  ;;  %v955_v11 = vmul.f32 %v1989_v20, %v2569_v4  ;;  %v823_v25 = vadd.f32 %v799_v1, %v3322_v37 }
 0x13c   : > { %v822_v63 = vadd.f32 %v798_v51, %v3321_v34  ;;  %v874_v0 = vadd.f32 %v3323_v61, %v770_v9  ;;  %v1006_v55 = vmul.f32 %v1987_v19, %v2433_v57  ;;  %v875_v60 = vadd.f32 %v3324_v32, %v771_v46 }
 0x13d   : > { %v1007_v33 = vmul.f32 %v1987_v19, %v2435_v49  ;;  %v1058_v45 = vmul.f32 %v2032_v38, %v2613_v28  ;;  %v1059_v29 = vmul.f32 %v2032_v38, %v2605_v5  ;;  %v927_v51 = vadd.f32 %v903_v50, %v823_v25  ;;  %v437_v25 = vpop.f32.mrb[40].mxu0 }
 0x13e   : > { %v926_v17 = vadd.f32 %v902_v43, %v822_v63  ;;  %v978_v34 = vadd.f32 %v954_v42, %v874_v0  ;;  %v2653_v37 = vmax.f32 %v429_v16, 0.0  ;;  %v979_v61 = vadd.f32 %v955_v11, %v875_v60  ;;  %v1604_v43 = vpop.f32.mrb[41].mxu0 }
 0x13f   : > { %v2655_v9 = vmax.f32 %v432_v22, 0.0  ;;  %v3325_v57 = vrot.slane %v2483_v36, 7  ;;  %v3326_v1 = vrot.slane %v2465_v24, 7  ;;  %v3328_v31 = vrot.slane %v2435_v49, 7 }
 0x140   : > { %v1030_v63 = vadd.f32 %v1006_v55, %v926_v17  ;;  %v1031_v42 = vadd.f32 %v1007_v33, %v927_v51  ;;  %v1082_v16 = vadd.f32 %v1058_v45, %v978_v34  ;;  %v1083_v50 = vadd.f32 %v1059_v29, %v979_v61 }
 0x141   : > { %v2663_v46 = vsel %vm538_vm2, %v3326_v1, %v3325_v57  ;;  %v3327_v32 = vmov %v3326_v1  ;;  %v2677_v60 = vmul.f32 %v1968_v3, %v2653_v37  ;;  %v2681_v49 = vmul.f32 %v1978_v10, %v2653_v37 }
 0x142   : > { %v2671_v0 = vsel %vm538_vm2, %v3328_v31, %v3327_v32  ;;  %v440_v31 = vpop.f32.mrb[42].mxu0  ;;  %v1106_v57 = vadd.f32 %v1082_v16, %v1030_v63  ;;  %v2687_v33 = vmul.f32 %v1968_v3, %v2655_v9  ;;  %v1107_v45 = vadd.f32 %v1083_v50, %v1031_v42 }
 0x143   : > { %3329 = vst [vmem:[#allocation27_spill] sm:$0xff] %v2677_v60  ;;  %v1605_v29 = vpop.f32.mrb[43].mxu0  ;;  %v2691_v51 = vmul.f32 %v1978_v10, %v2655_v9  ;;  %v3332_v34 = vrot.slane %v2559_v21, 1  ;;  %v3333_v61 = vrot.slane %v2483_v36, 1  ;;  %v3335_v63 = vrot.slane %v2465_v24, 1 }
 0x144   : > { %3330 = vst [vmem:[#allocation31_spill] sm:$0xff] %v2687_v33  ;;  %v644_v42 = vmul.f32 %v1974_v6, %v2303_v12  ;;  %v645_v43 = vmul.f32 %v1974_v6, %v2325_v48  ;;  %v748_v50 = vmul.f32 %v1976_v7, %v2329_v8  ;;  %v749_v29 = vmul.f32 %v1976_v7, %v2386_v23  ;;  %v3336_v23 = vld [vmem:[#allocation36_spill] sm:$0xff] }
 0x145   : > { %3331 = vst [vmem:[#allocation38_spill] sm:$0xff] %v2691_v51  ;;  %v2699_v1 = vsel %vm599_vm3, %v3333_v61, %v3332_v34  ;;  %v3334_v32 = vmov %v3333_v61  ;;  %v1127_v34 = vpack.c.bf16 %v1107_v45, %v1106_v57  ;;  %v800_v12 = vmul.f32 %v1982_v13, %v2473_v53 }
 0x146   : > { %v614_v16 = vsel %vm599_vm3, %v3335_v63, %v3334_v32  ;;  %v2720_v55 = vmul.f32 %v1976_v7, %v2699_v1  ;;  %v772_v32 = vadd.f32 %v748_v50, %v644_v42  ;;  %v773_v63 = vadd.f32 %v749_v29, %v645_v43  ;;  %v3337_v42 = vld [vmem:[#allocation37_spill] sm:$0xff]  ;;  %v3338_v50 = vld [vmem:[#allocation42_spill] sm:$0xff] }
 0x147   : > { %v2716_v61 = vmul.f32 %v1976_v7, %v614_v16  ;;  %v801_v48 = vmul.f32 %v1982_v13, %v2577_v26  ;;  %v904_v8 = vmul.f32 %v1984_v14, %v2491_v52  ;;  %1643 = vmatmul.mubr.bf16.gmra.mrb[20].mxu1 %v1127_v34  ;;  %v824_v57 = vadd.f32 %v800_v12, %v3336_v23 }
 0x148   : > { %v905_v45 = vmul.f32 %v1984_v14, %v2613_v28  ;;  %v956_v22 = vmul.f32 %v1989_v20, %v2671_v0  ;;  %v957_v17 = vmul.f32 %v1989_v20, %v2663_v46  ;;  %v876_v29 = vadd.f32 %v3338_v50, %v772_v32 }
 0x149   : > { %v825_v43 = vadd.f32 %v801_v48, %v3337_v42  ;;  %v877_v11 = vadd.f32 %v2447_v58, %v773_v63  ;;  %v1008_v52 = vmul.f32 %v1987_v19, %v2465_v24  ;;  %v928_v34 = vadd.f32 %v904_v8, %v824_v57 }
 0x14a   : > { %v1009_v12 = vmul.f32 %v1987_v19, %v2483_v36  ;;  %v1060_v28 = vmul.f32 %v2032_v38, %v614_v16  ;;  %v1061_v23 = vmul.f32 %v2032_v38, %v2699_v1  ;;  %v980_v60 = vadd.f32 %v956_v22, %v876_v29 }
 0x14b   : > { %v929_v33 = vadd.f32 %v905_v45, %v825_v43  ;;  %v981_v51 = vadd.f32 %v957_v17, %v877_v11  ;;  %v2745_v48 = vmax.f32 %v437_v25, 0.0  ;;  %v1032_v32 = vadd.f32 %v1008_v52, %v928_v34 }
 0x14c   : > { %v2747_v42 = vmax.f32 %v440_v31, 0.0  ;;  %v3339_v58 = vrot.slane %v2561_v35, 7  ;;  %v3340_v24 = vrot.slane %v2559_v21, 7  ;;  %v3342_v57 = vrot.slane %v2483_v36, 7 }
 0x14d   : > { %v1033_v25 = vadd.f32 %v1009_v12, %v929_v33  ;;  %v1084_v11 = vadd.f32 %v1060_v28, %v980_v60  ;;  %v1085_v31 = vadd.f32 %v1061_v23, %v981_v51  ;;  %v589_v45 = vrot.slane %v2745_v48, 1 }
 0x14e   : > { %v2755_v63 = vsel %vm538_vm2, %v3340_v24, %v3339_v58  ;;  %v3341_v8 = vmov %v3340_v24  ;;  %v2769_v43 = vmul.f32 %v1968_v3, %v2745_v48  ;;  %v2773_v50 = vmul.f32 %v1978_v10, %v2745_v48 }
 0x14f   : > { %v2763_v22 = vsel %vm538_vm2, %v3342_v57, %v3341_v8  ;;  %v1108_v29 = vadd.f32 %v1084_v11, %v1032_v32  ;;  %v1109_v52 = vadd.f32 %v1085_v31, %v1033_v25  ;;  %v2779_v60 = vmul.f32 %v1968_v3, %v2747_v42 }
 0x150   : > { %v2783_v51 = vmul.f32 %v1978_v10, %v2747_v42  ;;  %v3343_v34 = vrot.slane %v2653_v37, 1  ;;  %v3344_v12 = vrot.slane %v2561_v35, 1  ;;  %v3346_v32 = vrot.slane %v2559_v21, 1 }
 0x151   : > { %v646_v58 = vmul.f32 %v1974_v6, %v2481_v30  ;;  %v1128_v24 = vpack.c.bf16 %v1109_v52, %v1108_v29  ;;  %v647_v8 = vmul.f32 %v1974_v6, %v2473_v53  ;;  %v802_v31 = vmul.f32 %v1982_v13, %v2569_v4 }
 0x152   : > { %v2791_v28 = vsel %vm599_vm3, %v3344_v12, %v3343_v34  ;;  %v3345_v23 = vmov %v3344_v12  ;;  %v803_v34 = vmul.f32 %v1982_v13, %v2671_v0  ;;  %v906_v30 = vmul.f32 %v1984_v14, %v2605_v5  ;;  %v3347_v12 = vld [vmem:[#allocation39_spill] sm:$0xff] }
 0x153   : > { %v612_v3 = vsel %vm599_vm3, %v3346_v32, %v3345_v23  ;;  %v2808_v25 = vmul.f32 %v1976_v7, %v2791_v28  ;;  %v774_v11 = vadd.f32 %v2526_v62, %v646_v58  ;;  %1646 = vmatprep.mubr.bf16.mxu1 %v1128_v24  ;;  %v775_v53 = vadd.f32 %v2530_v39, %v647_v8  ;;  %v3348_v32 = vld [vmem:[#allocation41_spill] sm:$0xff] }
 0x154   : > { %v2804_v57 = vmul.f32 %v1976_v7, %v612_v3  ;;  %v907_v29 = vmul.f32 %v1984_v14, %v614_v16  ;;  %v958_v52 = vmul.f32 %v1989_v20, %v2763_v22  ;;  %v959_v62 = vmul.f32 %v1989_v20, %v2755_v63 }
 0x155   : > { %v826_v23 = vadd.f32 %v802_v31, %v3347_v12  ;;  %v827_v58 = vadd.f32 %v803_v34, %v3348_v32  ;;  %v878_v33 = vadd.f32 %v2457_v44, %v774_v11  ;;  %v1010_v5 = vmul.f32 %v1987_v19, %v2559_v21 }
 0x156   : > { %v879_v24 = vadd.f32 %v2501_v27, %v775_v53  ;;  %v1011_v39 = vmul.f32 %v1987_v19, %v2561_v35  ;;  %v1062_v16 = vmul.f32 %v2032_v38, %v612_v3  ;;  %v1063_v8 = vmul.f32 %v2032_v38, %v2791_v28 }
 0x157   : > { %v930_v17 = vadd.f32 %v906_v30, %v826_v23  ;;  %v931_v36 = vadd.f32 %v907_v29, %v827_v58  ;;  %v982_v31 = vadd.f32 %v958_v52, %v878_v33  ;;  %v3349_v34 = vrot.slane %v2655_v9, 7 }
 0x158   : > { %v3350_v44 = vrot.slane %v2653_v37, 7  ;;  %v983_v27 = vadd.f32 %v959_v62, %v879_v24  ;;  %v3352_v53 = vrot.slane %v2561_v35, 7  ;;  %v3353_v33 = vrot.slane %v2655_v9, 1 }
 0x159   : > { %v3355_v52 = vrot.slane %v2653_v37, 1  ;;  %v1034_v35 = vadd.f32 %v1010_v5, %v930_v17  ;;  %v1035_v23 = vadd.f32 %v1011_v39, %v931_v36  ;;  %v1086_v32 = vadd.f32 %v1062_v16, %v982_v31 }
 0x15a   : > { %v2840_v21 = vsel %vm538_vm2, %v3350_v44, %v3349_v34  ;;  %v3351_v11 = vmov %v3350_v44  ;;  %v2856_v30 = vsel %vm599_vm3, %v3353_v33, %v589_v45  ;;  %v3354_v29 = vmov %v3353_v33 }
 0x15b   : > { %v2848_v12 = vsel %vm538_vm2, %v3352_v53, %v3351_v11  ;;  %v610_v62 = vsel %vm599_vm3, %v3355_v52, %v3354_v29  ;;  %v648_v58 = vmul.f32 %v1974_v6, %v2577_v26  ;;  %v1087_v24 = vadd.f32 %v1063_v8, %v983_v27 }
 0x15c   : > { %v649_v34 = vmul.f32 %v1974_v6, %v2569_v4  ;;  %v2869_v44 = vmul.f32 %v1976_v7, %v610_v62  ;;  %v2873_v11 = vmul.f32 %v1976_v7, %v2856_v30  ;;  %v1110_v53 = vadd.f32 %v1086_v32, %v1034_v35 }
 0x15d   : > { %v776_v33 = vadd.f32 %v2621_v40, %v648_v58  ;;  %v804_v17 = vmul.f32 %v1982_v13, %v2663_v46  ;;  %v805_v26 = vmul.f32 %v1982_v13, %v2763_v22  ;;  %v1111_v36 = vadd.f32 %v1087_v24, %v1035_v23 }
 0x15e   : > { %v777_v5 = vadd.f32 %v2625_v47, %v649_v34  ;;  %v908_v4 = vmul.f32 %v1984_v14, %v2699_v1  ;;  %v909_v39 = vmul.f32 %v1984_v14, %v612_v3  ;;  %v960_v31 = vmul.f32 %v1989_v20, %v2848_v12 }
 0x15f   : > { %v828_v16 = vadd.f32 %v804_v17, %v2443_v59  ;;  %v829_v8 = vadd.f32 %v805_v26, %v2453_v18  ;;  %v880_v40 = vadd.f32 %v2512_v41, %v776_v33  ;;  %v1129_v27 = vpack.c.bf16 %v1111_v36, %v1110_v53  ;;  %v3360_v17 = vld [vmem:[#allocation2_spill] sm:$0xff] }
 0x160   : > { %v881_v29 = vadd.f32 %v2587_v2, %v777_v5  ;;  %v961_v47 = vmul.f32 %v1989_v20, %v2840_v21  ;;  %v1012_v1 = vmul.f32 %v1987_v19, %v2653_v37  ;;  %v1013_v59 = vmul.f32 %v1987_v19, %v2655_v9 }
 0x161   : > { %v932_v52 = vadd.f32 %v908_v4, %v828_v16  ;;  %v933_v3 = vadd.f32 %v909_v39, %v829_v8  ;;  %v984_v35 = vadd.f32 %v960_v31, %v880_v40  ;;  %1647 = vmatmul.mubr.bf16.gmra.mrb[24].mxu1 %v1129_v27  ;;  %v1064_v41 = vmul.f32 %v2032_v38, %v610_v62 }
 0x162   : > { %v985_v18 = vadd.f32 %v961_v47, %v881_v29  ;;  %v1065_v23 = vmul.f32 %v2032_v38, %v2856_v30  ;;  %v3356_v2 = vrot.slane %v2747_v42, 7  ;;  %v3357_v32 = vrot.slane %v2745_v48, 7 }
 0x163   : > { %v1036_v58 = vadd.f32 %v1012_v1, %v932_v52  ;;  %v1037_v24 = vadd.f32 %v1013_v59, %v933_v3  ;;  %v3359_v53 = vrot.slane %v2655_v9, 7  ;;  %v3361_v26 = vrot.slane %v3360_v17, 1 }
 0x164   : > { %v2905_v37 = vsel %vm538_vm2, %v3357_v32, %v3356_v2  ;;  %v3358_v34 = vmov %v3357_v32  ;;  %v3362_v36 = vrot.slane %v2747_v42, 1  ;;  %v1088_v4 = vadd.f32 %v1064_v41, %v984_v35 }
 0x165   : > { %v2913_v33 = vsel %vm538_vm2, %v3359_v53, %v3358_v34  ;;  %v1089_v39 = vadd.f32 %v1065_v23, %v985_v18  ;;  %v650_v8 = vmul.f32 %v1974_v6, %v2671_v0  ;;  %v651_v40 = vmul.f32 %v1974_v6, %v2663_v46  ;;  %v3364_v18 = vld [vmem:[#allocation45_spill] sm:$0xff] }
 0x166   : > { %v2921_v5 = vsel %vm599_vm3, %v3362_v36, %v3361_v26  ;;  %v3363_v16 = vmov %v3362_v36  ;;  %v806_v29 = vmul.f32 %v1982_v13, %v2755_v63  ;;  %v1112_v47 = vadd.f32 %v1088_v4, %v1036_v58 }
 0x167   : > { %v608_v9 = vsel %vm599_vm3, %v589_v45, %v3363_v16  ;;  %v2938_v27 = vmul.f32 %v1976_v7, %v2921_v5  ;;  %v1113_v1 = vadd.f32 %v1089_v39, %v1037_v24  ;;  %v778_v45 = vadd.f32 %v2716_v61, %v650_v8 }
 0x168   : > { %v2934_v31 = vmul.f32 %v1976_v7, %v608_v9  ;;  %v807_v0 = vmul.f32 %v1982_v13, %v2848_v12  ;;  %v779_v52 = vadd.f32 %v2720_v55, %v651_v40  ;;  %v830_v46 = vadd.f32 %v806_v29, %v2497_v15 }
 0x169   : > { %v910_v3 = vmul.f32 %v1984_v14, %v2791_v28  ;;  %v911_v7 = vmul.f32 %v1984_v14, %v610_v62  ;;  %v1130_v35 = vpack.c.bf16 %v1113_v1, %v1112_v47  ;;  %v882_v41 = vadd.f32 %v3364_v18, %v778_v45  ;;  %v3367_v47 = vld [vmem:[#allocation43_spill] sm:$0xff]  ;;  %v3368_v1 = vld [vmem:[#allocation44_spill] sm:$0xff] }
 0x16a   : > { %v831_v59 = vadd.f32 %v807_v0, %v2508_v54  ;;  %v962_v61 = vmul.f32 %v1989_v20, %v2913_v33  ;;  %v883_v23 = vadd.f32 %v2681_v49, %v779_v52  ;;  %v963_v55 = vmul.f32 %v1989_v20, %v2905_v37  ;;  %v3369_v52 = vld [vmem:[#allocation38_spill] sm:$0xff] }
 0x16b   : > { %v934_v2 = vadd.f32 %v910_v3, %v830_v46  ;;  %v1014_v15 = vmul.f32 %v1987_v19, %v2745_v48  ;;  %1650 = vmatprep.mubr.bf16.mxu1 %v1130_v35  ;;  %v1015_v54 = vmul.f32 %v1987_v19, %v2747_v42  ;;  %v1066_v32 = vmul.f32 %v2032_v38, %v608_v9  ;;  %v3373_v35 = vld [vmem:[#allocation3_spill] sm:$0xff] }
 0x16c   : > { %v935_v28 = vadd.f32 %v911_v7, %v831_v59  ;;  %v986_v62 = vadd.f32 %v962_v61, %v882_v41  ;;  %v987_v58 = vadd.f32 %v963_v55, %v883_v23  ;;  %v1067_v49 = vmul.f32 %v2032_v38, %v2921_v5 }
 0x16d   : > { %v1038_v24 = vadd.f32 %v1014_v15, %v934_v2  ;;  %v3365_v34 = vrot.slane %v3360_v17, 7  ;;  %v3366_v53 = vrot.slane %v2747_v42, 7  ;;  %v652_v19 = vmul.f32 %v1974_v6, %v2763_v22  ;;  %v3375_v2 = vld [vmem:[#allocation17_spill] sm:$0xff] }
 0x16e   : > { %v1039_v26 = vadd.f32 %v1015_v54, %v935_v28  ;;  %v1090_v36 = vadd.f32 %v1066_v32, %v986_v62  ;;  %v653_v4 = vmul.f32 %v1974_v6, %v2755_v63  ;;  %v1091_v39 = vadd.f32 %v1067_v49, %v987_v58  ;;  %v3378_v62 = vld [vmem:[#allocation10_spill] sm:$0xff] }
 0x16f   : > { %v2970_v48 = vsel %vm538_vm2, %v3366_v53, %v3365_v34  ;;  %v808_v38 = vmul.f32 %v1982_v13, %v2840_v21  ;;  %v809_v17 = vmul.f32 %v1982_v13, %v2913_v33  ;;  %v912_v42 = vmul.f32 %v1984_v14, %v2856_v30  ;;  %v3380_v34 = vld [vmem:[#allocation7_spill] sm:$0xff] }
 0x170   : > { %v1114_v16 = vadd.f32 %v1090_v36, %v1038_v24  ;;  %v780_v8 = vadd.f32 %v2804_v57, %v652_v19  ;;  %v781_v40 = vadd.f32 %v2808_v25, %v653_v4  ;;  %v913_v22 = vmul.f32 %v1984_v14, %v608_v9  ;;  %v2994_v57 = vld [vmem:[%s3226_s2 + $0x8] ss:$0 sm:$0xff]  ;;  %v3370_v25 = vld [vmem:[#allocation16_spill] sm:$0xff]  ;;  %v3379_v24 = vld [vmem:[#allocation6_spill] sm:$0xff] }
 0x171   : > { %v1115_v29 = vadd.f32 %v1091_v39, %v1039_v26  ;;  %v832_v63 = vadd.f32 %v808_v38, %v3367_v47  ;;  %v833_v45 = vadd.f32 %v809_v17, %v3368_v1  ;;  %v964_v0 = vmul.f32 %v1989_v20, %v2970_v48  ;;  %v3371_v9 = vld [vmem:[#allocation8_spill] sm:$0xff]  ;;  %v3381_v36 = vld [vmem:[#allocation11_spill] sm:$0xff] }
 0x172   : > { %v884_v46 = vadd.f32 %v3369_v52, %v780_v8  ;;  %v885_v3 = vadd.f32 %v2773_v50, %v781_v40  ;;  %v1069_v30 = vmul.f32 %v2994_v57, %v3370_v25  ;;  %v3372_v7 = vrot.slane %v3371_v9, 7  ;;  %v3382_v38 = vld [vmem:[#allocation27_spill] sm:$0xff]  ;;  %v3384_v47 = vld [vmem:[#allocation4_spill] sm:$0xff] }
 0x173   : > { %v3374_v59 = vrot.slane %v3373_v35, 7  ;;  %v1131_v41 = vpack.c.bf16 %v1115_v29, %v1114_v16  ;;  %v936_v61 = vadd.f32 %v912_v42, %v832_v63  ;;  %v937_v23 = vadd.f32 %v913_v22, %v833_v45  ;;  %v3383_v17 = vld [vmem:[#allocation31_spill] sm:$0xff]  ;;  %v3385_v45 = vld [vmem:[#allocation12_spill] sm:$0xff] }
 0x174   : > { %v3376_v50 = vrot.slane %v3375_v2, 1  ;;  %v3377_v55 = vrot.slane %v3371_v9, 1  ;;  %v988_v28 = vadd.f32 %v964_v0, %v884_v46  ;;  %v989_v54 = vadd.f32 %v3378_v62, %v885_v3  ;;  %v3386_v0 = vld [vmem:[#allocation19_spill] sm:$0xff] }
 0x175   : > { %v544_v18 = vsel %vm538_vm2, %v3374_v59, %v3372_v7  ;;  %v654_v32 = vmul.f32 %v1974_v6, %v2848_v12  ;;  %v655_v58 = vmul.f32 %v1974_v6, %v2840_v21  ;;  %1651 = vmatmul.mubr.bf16.gmra.mrb[28].mxu1 %v1131_v41  ;;  %v1040_v49 = vadd.f32 %v3379_v24, %v936_v61  ;;  %v3389_v59 = vld [vmem:[#allocation18_spill] sm:$0xff] }
 0x176   : > { %v604_v15 = vsel %vm599_vm3, %v3377_v55, %v3376_v50  ;;  %v1041_v53 = vadd.f32 %v3380_v34, %v937_v23  ;;  %v810_v26 = vmul.f32 %v1982_v13, %v2905_v37  ;;  %v811_v56 = vmul.f32 %v1982_v13, %v2970_v48 }
 0x177   : > { %v1092_v19 = vadd.f32 %v3381_v36, %v988_v28  ;;  %v1093_v4 = vadd.f32 %v1069_v30, %v989_v54  ;;  %v782_v39 = vadd.f32 %v2869_v44, %v654_v32  ;;  %v783_v12 = vadd.f32 %v2873_v11, %v655_v58  ;;  %v3387_v30 = vld [vmem:[#allocation23_spill] sm:$0xff]  ;;  %v3390_v28 = vld [vmem:[#allocation13_spill] sm:$0xff] }
 0x178   : > { %v834_v21 = vadd.f32 %v810_v26, %v3382_v38  ;;  %v835_v42 = vadd.f32 %v811_v56, %v3383_v17  ;;  %v914_v16 = vmul.f32 %v1984_v14, %v2921_v5  ;;  %v966_v8 = vmul.f32 %v1989_v20, %v544_v18  ;;  %v3394_v56 = vld [vmem:[#allocation24_spill] sm:$0xff]  ;;  %v3399_v17 = vld [vmem:[#allocation34_spill] sm:$0xff] }
 0x179   : > { %v1116_v40 = vadd.f32 %v1092_v19, %v1040_v49  ;;  %v1117_v22 = vadd.f32 %v1093_v4, %v1041_v53  ;;  %v886_v29 = vadd.f32 %v2783_v51, %v782_v39  ;;  %v887_v63 = vadd.f32 %v3384_v47, %v783_v12  ;;  %v3388_v51 = vld [vmem:[#allocation15_spill] sm:$0xff]  ;;  %v3391_v49 = vld [vmem:[#allocation5_spill] sm:$0xff]  ;;  %v3397_v12 = vld [vmem:[#allocation20_spill] sm:$0xff] }
 0x17a   : > { %v938_v1 = vadd.f32 %v914_v16, %v834_v21  ;;  %v939_v44 = vadd.f32 %v3385_v45, %v835_v42  ;;  %v967_v11 = vmul.f32 %v1989_v20, %v3386_v0  ;;  %v1070_v52 = vmul.f32 %v2994_v57, %v604_v15  ;;  %v3392_v53 = vld [vmem:[#allocation21_spill] sm:$0xff]  ;;  %v3398_v21 = vld [vmem:[#allocation22_spill] sm:$0xff] }
 0x17b   : > { %v1132_v46 = vpack.c.bf16 %v1117_v22, %v1116_v40  ;;  %v990_v3 = vadd.f32 %v966_v8, %v886_v29  ;;  %v1071_v5 = vmul.f32 %v2994_v57, %v3387_v30  ;;  %v656_v9 = vmul.f32 %v1974_v6, %v2913_v33  ;;  %v3396_v4 = vld [vmem:[#allocation25_spill] sm:$0xff]  ;;  %v3400_v8 = vld [vmem:[#allocation26_spill] sm:$0xff]  ;;  %v3405_v30 = vld [vmem:[#allocation35_spill] sm:$0xff] }
 0x17c   : > { %v991_v7 = vadd.f32 %v967_v11, %v887_v63  ;;  %v1042_v35 = vadd.f32 %v3388_v51, %v938_v1  ;;  %v1043_v41 = vadd.f32 %v3389_v59, %v939_v44  ;;  %v657_v61 = vmul.f32 %v1974_v6, %v2905_v37  ;;  %v3401_v29 = vld [vmem:[#allocation9_spill] sm:$0xff] }
 0x17d   : > { %1654 = vmatprep.mubr.bf16.mxu1 %v1132_v46  ;;  %v1094_v23 = vadd.f32 %v1070_v52, %v990_v3  ;;  %v784_v50 = vadd.f32 %v2934_v31, %v656_v9  ;;  %v813_v55 = vmul.f32 %v1982_v13, %v544_v18  ;;  %v836_v62 = vadd.f32 %v3390_v28, %v2769_v43  ;;  %v3393_v18 = vld [vmem:[#allocation14_spill] sm:$0xff]  ;;  %v3402_v1 = vld [vmem:[#allocation33_spill] sm:$0xff] }
 0x17e   : > { %v1095_v54 = vadd.f32 %v1071_v5, %v991_v7  ;;  %v785_v33 = vadd.f32 %v2938_v27, %v657_v61  ;;  %v916_v32 = vmul.f32 %v1984_v14, %v3370_v25  ;;  %v917_v58 = vmul.f32 %v1984_v14, %v604_v15  ;;  %v3395_v25 = vld [vmem:[#allocation29_spill] sm:$0xff]  ;;  %v3406_v7 = vld [vmem:[#allocation30_spill] sm:$0xff] }
 0x17f   : > { %v1118_v24 = vadd.f32 %v1094_v23, %v1042_v35  ;;  %v837_v37 = vadd.f32 %v813_v55, %v2779_v60  ;;  %v888_v34 = vadd.f32 %v3391_v49, %v784_v50  ;;  %v968_v31 = vmul.f32 %v1989_v20, %v3392_v53  ;;  %v1718_v55 = vld [vmem:[%s1857_s29 + $0x28] sm:$0xff]  ;;  %v1721_v49 = vld [vmem:[%s1857_s29 + $0x20] sm:$0xff] }
 0x180   : > { %v1119_v13 = vadd.f32 %v1095_v54, %v1043_v41  ;;  %v889_v26 = vadd.f32 %v3393_v18, %v785_v33  ;;  %v940_v43 = vadd.f32 %v916_v32, %v836_v62  ;;  %v1072_v27 = vmul.f32 %v2994_v57, %v3394_v56  ;;  %v1719_v33 = vld [vmem:[%s1857_s29 + $0x18] sm:$0xff] }
 0x181   : > { %v941_v36 = vadd.f32 %v917_v58, %v837_v37  ;;  %v992_v19 = vadd.f32 %v968_v31, %v888_v34  ;;  %v1073_v14 = vmul.f32 %v2994_v57, %v3395_v25  ;;  %v658_v60 = vmul.f32 %v1974_v6, %v2970_v48  ;;  %v3403_v48 = vld [vmem:[#allocation28_spill] sm:$0xff] }
 0x182   : > { %v1133_v15 = vpack.c.bf16 %v1119_v13, %v1118_v24  ;;  %v993_v39 = vadd.f32 %v3396_v4, %v889_v26  ;;  %v1044_v38 = vadd.f32 %v3397_v12, %v940_v43  ;;  %v995_v42 = vadd.f32 %v3399_v17, %v3398_v21  ;;  %v1720_v24 = vld [vmem:[%s1857_s29 + $0x30] sm:$0xff]  ;;  %v1722_v43 = vld [vmem:[%s1857_s29 + $0x48] sm:$0xff]  ;;  %v1725_v4 = vld [vmem:[%s1857_s29 + $0x40] sm:$0xff] }
 0x183   : > { %v866_v16 = vmul.f32 %v1978_v10, %v3375_v2  ;;  %v1045_v40 = vadd.f32 %v3400_v8, %v941_v36  ;;  %v1096_v22 = vadd.f32 %v1072_v27, %v992_v19  ;;  %v786_v47 = vadd.f32 %v3401_v29, %v658_v60  ;;  %v3404_v2 = vld [vmem:[#allocation32_spill] sm:$0xff]  ;;  %v1723_v19 = vld [vmem:[%s1857_s29 + $0x38] sm:$0xff] }
 0x184   : > { %1655 = vmatmul.mubr.bf16.gmra.mrb[32].mxu1 %v1133_v15  ;;  %v1097_v63 = vadd.f32 %v1073_v14, %v993_v39  ;;  %v1075_v6 = vmul.f32 %v2994_v57, %v3402_v1  ;;  %v970_v45 = vmul.f32 %v1989_v20, %v3403_v48  ;;  %v1074_v46 = vmul.f32 %v2994_v57, %v3404_v2  ;;  %v1724_v60 = vld [vmem:[%s1857_s29 + $0x50] sm:$0xff]  ;;  %v1727_v29 = vld [vmem:[%s1857_s29 + $0x58] sm:$0xff]  ;;  %v1729_v48 = vld [vmem:[%s1857_s29 + $0x60] sm:$0xff] }
 0x185   : > { %v1120_v44 = vadd.f32 %v1096_v22, %v1044_v38  ;;  %v890_v0 = vadd.f32 %v866_v16, %v786_v47  ;;  %v3407_v20 = vlaneseq  ;;  %v1726_v16 = vld [vmem:[%s1857_s29 + $0x68] sm:$0xff]  ;;  %v1728_v1 = vld [vmem:[%s1857_s29 + $0x70] sm:$0xff] }
 0x186   : > { %v1121_v11 = vadd.f32 %v1097_v63, %v1045_v40  ;;  %v1099_v52 = vadd.f32 %v1075_v6, %v995_v42  ;;  %v1730_v2 = vld [vmem:[%s1857_s29 + $0x88] sm:$0xff] }
 0x187   : > { %v994_v10 = vadd.f32 %v970_v45, %v890_v0  ;;  %v3081_v59 = vand.u32 127, %v3407_v20  ;;  %v1733_v20 = vld [vmem:[%s1857_s29 + $0x80] sm:$0xff] }
 0x188   : > { %v1134_v3 = vpack.c.bf16 %v1121_v11, %v1120_v44  ;;  %v1123_v5 = vadd.f32 %v1099_v52, %v3405_v30 }
 0x189   : > { %v1098_v9 = vadd.f32 %v1074_v46, %v994_v10  ;;  %vm1355_vm4 = vcmp.lt.s32.totalorder %v3081_v59, 8 }
 0x18a   : > { %1658 = vmatprep.mubr.bf16.mxu1 %v1134_v3 }
 0x18b   : > { %v1122_v51 = vadd.f32 %v1098_v9, %v3406_v7 }
 0x18d   : > { %v1135_v35 = vpack.c.bf16 %v1123_v5, %v1122_v51  ;;  %v1731_v5 = vld [vmem:[%s1857_s29 + $0x78] sm:$0xff]  ;;  %v1732_v51 = vld [vmem:[%s1857_s29 + $0x90] sm:$0xff] }
 0x18f   : > { %1659 = vmatmul.mubr.bf16.gmra.mrb[36].mxu1 %v1135_v35 }
 0x203   : > { %v1640_v57 = vpop.f32.mrb[16].mxu1 }
 0x204   : > { %v1331_v41 = vmax.f32 %v1640_v57, 0.0  ;;  %v1234_v61 = vpop.f32.mrb[17].mxu1 }
 0x205   : > { %v1329_v23 = vmax.f32 %v1234_v61, 0.0  ;;  %v1641_v50 = vpop.f32.mrb[18].mxu1 }
 0x206   : > { %v1358_v28 = vsel %vm1355_vm4, %v1718_v55, %v1331_v41  ;;  %v1332_v62 = vmax.f32 %v1641_v50, 0.0  ;;  %v1237_v54 = vpop.f32.mrb[19].mxu1 }
 0x207   : > { %1382 = vst.msk [vmem:[%s3087_s14 + $0x10] sm:$0xff] %vm277_vm1, %v1358_v28  ;;  %v1356_v32 = vsel %vm1355_vm4, %v1719_v33, %v1329_v23  ;;  %v1330_v58 = vmax.f32 %v1237_v54, 0.0  ;;  %v1734_v28 = vld [vmem:[%s1857_s29 + $0xa8] sm:$0xff] }
 0x208   : > { %1380 = vst.msk [vmem:[%s3087_s14] sm:$0xff] %vm277_vm1, %v1356_v32  ;;  %v1359_v37 = vsel %vm1355_vm4, %v1720_v24, %v1332_v62  ;;  %v1735_v32 = vld [vmem:[%s1857_s29 + $0x98] sm:$0xff] }
 0x209   : > { %1383 = vst.msk [vmem:[%s3087_s14 + $0x18] sm:$0xff] %vm277_vm1, %v1359_v37  ;;  %v1357_v34 = vsel %vm1355_vm4, %v1721_v49, %v1330_v58  ;;  %v1736_v37 = vld [vmem:[%s1857_s29 + $0xb0] sm:$0xff] }
 0x20a   : > { %1381 = vst.msk [vmem:[%s3087_s14 + $0x8] sm:$0xff] %vm277_vm1, %v1357_v34  ;;  %v1737_v34 = vld [vmem:[%s1857_s29 + $0xa0] sm:$0xff] }
 0x21a   : > { %v1644_v53 = vpop.f32.mrb[20].mxu1 }
 0x21b   : > { %v1335_v31 = vmax.f32 %v1644_v53, 0.0  ;;  %v1250_v13 = vpop.f32.mrb[21].mxu1 }
 0x21c   : > { %v1333_v18 = vmax.f32 %v1250_v13, 0.0  ;;  %v1645_v26 = vpop.f32.mrb[22].mxu1 }
 0x21d   : > { %v1362_v56 = vsel %vm1355_vm4, %v1722_v43, %v1335_v31  ;;  %v1336_v27 = vmax.f32 %v1645_v26, 0.0  ;;  %v1253_v36 = vpop.f32.mrb[23].mxu1 }
 0x21e   : > { %1386 = vst.msk [vmem:[%s3087_s14 + $0x30] sm:$0xff] %vm277_vm1, %v1362_v56  ;;  %v1360_v25 = vsel %vm1355_vm4, %v1723_v19, %v1333_v18  ;;  %v1334_v14 = vmax.f32 %v1253_v36, 0.0  ;;  %v1738_v56 = vld [vmem:[%s1857_s29 + $0xc8] sm:$0xff] }
 0x21f   : > { %1384 = vst.msk [vmem:[%s3087_s14 + $0x20] sm:$0xff] %vm277_vm1, %v1360_v25  ;;  %v1363_v15 = vsel %vm1355_vm4, %v1724_v60, %v1336_v27  ;;  %v1739_v25 = vld [vmem:[%s1857_s29 + $0xb8] sm:$0xff] }
 0x220   : > { %1387 = vst.msk [vmem:[%s3087_s14 + $0x38] sm:$0xff] %vm277_vm1, %v1363_v15  ;;  %v1361_v39 = vsel %vm1355_vm4, %v1725_v4, %v1334_v14  ;;  %v1740_v15 = vld [vmem:[%s1857_s29 + $0xd0] sm:$0xff] }
 0x221   : > { %1385 = vst.msk [vmem:[%s3087_s14 + $0x28] sm:$0xff] %vm277_vm1, %v1361_v39  ;;  %v1741_v39 = vld [vmem:[%s1857_s29 + $0xc0] sm:$0xff] }
 0x234   : > { %v1648_v12 = vpop.f32.mrb[24].mxu1 }
 0x235   : > { %v1339_v38 = vmax.f32 %v1648_v12, 0.0  ;;  %v1266_v21 = vpop.f32.mrb[25].mxu1 }
 0x236   : > { %v1337_v17 = vmax.f32 %v1266_v21, 0.0  ;;  %v1649_v42 = vpop.f32.mrb[26].mxu1 }
 0x237   : > { %v1366_v8 = vsel %vm1355_vm4, %v1726_v16, %v1339_v38  ;;  %v1340_v40 = vmax.f32 %v1649_v42, 0.0  ;;  %v1269_v22 = vpop.f32.mrb[27].mxu1 }
 0x238   : > { %1390 = vst.msk [vmem:[%s3087_s14 + $0x50] sm:$0xff] %vm277_vm1, %v1366_v8  ;;  %v1364_v47 = vsel %vm1355_vm4, %v1727_v29, %v1337_v17  ;;  %v1338_v63 = vmax.f32 %v1269_v22, 0.0 }
 0x239   : > { %1388 = vst.msk [vmem:[%s3087_s14 + $0x40] sm:$0xff] %vm277_vm1, %v1364_v47  ;;  %v1367_v6 = vsel %vm1355_vm4, %v1728_v1, %v1340_v40 }
 0x23a   : > { %1391 = vst.msk [vmem:[%s3087_s14 + $0x58] sm:$0xff] %vm277_vm1, %v1367_v6  ;;  %v1365_v45 = vsel %vm1355_vm4, %v1729_v48, %v1338_v63 }
 0x23b   : > { %1389 = vst.msk [vmem:[%s3087_s14 + $0x48] sm:$0xff] %vm277_vm1, %v1365_v45 }
 0x248   : > { %v1652_v44 = vpop.f32.mrb[28].mxu1 }
 0x249   : > { %v1343_v0 = vmax.f32 %v1652_v44, 0.0  ;;  %v1282_v11 = vpop.f32.mrb[29].mxu1 }
 0x24a   : > { %v1341_v52 = vmax.f32 %v1282_v11, 0.0  ;;  %v1653_v10 = vpop.f32.mrb[30].mxu1 }
 0x24b   : > { %v1370_v46 = vsel %vm1355_vm4, %v1730_v2, %v1343_v0  ;;  %v1344_v3 = vmax.f32 %v1653_v10, 0.0  ;;  %v1285_v30 = vpop.f32.mrb[31].mxu1 }
 0x24c   : > { %1394 = vst.msk [vmem:[%s3087_s14 + $0x70] sm:$0xff] %vm277_vm1, %v1370_v46  ;;  %v1368_v9 = vsel %vm1355_vm4, %v1731_v5, %v1341_v52  ;;  %v1342_v7 = vmax.f32 %v1285_v30, 0.0 }
 0x24d   : > { %1392 = vst.msk [vmem:[%s3087_s14 + $0x60] sm:$0xff] %vm277_vm1, %v1368_v9  ;;  %v1371_v35 = vsel %vm1355_vm4, %v1732_v51, %v1344_v3 }
 0x24e   : > { %1395 = vst.msk [vmem:[%s3087_s14 + $0x78] sm:$0xff] %vm277_vm1, %v1371_v35  ;;  %v1369_v57 = vsel %vm1355_vm4, %v1733_v20, %v1342_v7 }
 0x24f   : > { %1393 = vst.msk [vmem:[%s3087_s14 + $0x68] sm:$0xff] %vm277_vm1, %v1369_v57 }
 0x257   : > { %v1656_v41 = vpop.f32.mrb[32].mxu1 }
 0x258   : > { %v1347_v61 = vmax.f32 %v1656_v41, 0.0  ;;  %v1298_v23 = vpop.f32.mrb[33].mxu1 }
 0x259   : > { %v1345_v50 = vmax.f32 %v1298_v23, 0.0  ;;  %v1657_v55 = vpop.f32.mrb[34].mxu1 }
 0x25a   : > { %v1374_v62 = vsel %vm1355_vm4, %v1734_v28, %v1347_v61  ;;  %v1348_v54 = vmax.f32 %v1657_v55, 0.0  ;;  %v1301_v33 = vpop.f32.mrb[35].mxu1 }
 0x25b   : > { %1398 = vst.msk [vmem:[%s3087_s14 + $0x90] sm:$0xff] %vm277_vm1, %v1374_v62  ;;  %v1372_v58 = vsel %vm1355_vm4, %v1735_v32, %v1345_v50  ;;  %v1346_v24 = vmax.f32 %v1301_v33, 0.0 }
 0x25c   : > { %1396 = vst.msk [vmem:[%s3087_s14 + $0x80] sm:$0xff] %vm277_vm1, %v1372_v58  ;;  %v1375_v49 = vsel %vm1355_vm4, %v1736_v37, %v1348_v54 }
 0x25d   : > { %1399 = vst.msk [vmem:[%s3087_s14 + $0x98] sm:$0xff] %vm277_vm1, %v1375_v49  ;;  %v1373_v53 = vsel %vm1355_vm4, %v1737_v34, %v1346_v24 }
 0x25e   : > { %1397 = vst.msk [vmem:[%s3087_s14 + $0x88] sm:$0xff] %vm277_vm1, %v1373_v53 }
 0x262   : > { %v1660_v31 = vpop.f32.mrb[36].mxu1 }
 0x263   : > { %v1351_v13 = vmax.f32 %v1660_v31, 0.0  ;;  %v1314_v18 = vpop.f32.mrb[37].mxu1 }
 0x264   : > { %v1349_v26 = vmax.f32 %v1314_v18, 0.0  ;;  %v1661_v43 = vpop.f32.mrb[38].mxu1 }
 0x265   : > { %v1378_v27 = vsel %vm1355_vm4, %v1738_v56, %v1351_v13  ;;  %v1352_v36 = vmax.f32 %v1661_v43, 0.0  ;;  %v1317_v19 = vpop.f32.mrb[39].mxu1 }
 0x266   : > { %1402 = vst.msk [vmem:[%s3087_s14 + $0xb0] sm:$0xff] %vm277_vm1, %v1378_v27  ;;  %v1376_v14 = vsel %vm1355_vm4, %v1739_v25, %v1349_v26  ;;  %v1350_v60 = vmax.f32 %v1317_v19, 0.0 }
 0x267   : > { %1400 = vst.msk [vmem:[%s3087_s14 + $0xa0] sm:$0xff] %vm277_vm1, %v1376_v14  ;;  %v1379_v4 = vsel %vm1355_vm4, %v1740_v15, %v1352_v36 }
 0x268   : > { %1403 = vst.msk [vmem:[%s3087_s14 + $0xb8] sm:$0xff] %vm277_vm1, %v1379_v4  ;;  %v1377_v12 = vsel %vm1355_vm4, %v1741_v39, %v1350_v60 }
 0x269   : > { %1401 = vst.msk [vmem:[%s3087_s14 + $0xa8] sm:$0xff] %vm277_vm1, %v1377_v12 }
 0x26a PF: > { %s14_s19 = sadd.s32 1, %s1780_s19   ;;  %s3408_s15 = smov %s1772_s17 }
 0x26b   : > { %p11_p7 = scmp.ge.s32.totalorder %s14_s19, 6   ;;  %s3409_s16 = smov %s1776_s18 }
 0x26c   : > { %s3410_s17 = smov %s3413_s20  ;;  %s3411_s18 = smov %s3417_s21 }
 0x26d   :  { %13 = sbr.rel (!%p11_p7) target bundleno = 3 (0x3), region = 67 }

</bundles_post_ra>
